<compile_context>
chip_gen: v6e
topology: v6e:2x2x1
jax: 0.10.0
libtpu: 0.0.40
codegen_flags: <defaults>
</compile_context>

<pallas_src>
import jax
import jax.numpy as jnp
from jax.experimental import pallas as pl
from jax.experimental.pallas import tpu as pltpu

_LANES = 1024                  # lane-dense last dim (multiple of 128)
_TILE_BYTES = 2 * 1024 * 1024  # ~2 MiB per input tile; ~8 MiB double-buffered
_SMALL_N = 16384               # below this, skip the Pallas launch entirely


def _sigmoid_kernel(x_ref, o_ref):
    # Compute in f32; sigmoid(x) = 0.5 * tanh(0.5 * x) + 0.5 (tanh -> EUP slot).
    xf = x_ref[...].astype(jnp.float32)
    y = 0.5 * jnp.tanh(0.5 * xf) + 0.5
    o_ref[...] = y.astype(o_ref.dtype)


def sigmoid_pallas(x: jax.Array) -> jax.Array:
    """Elementwise sigmoid 1/(1+exp(-x)); Pallas TPU kernel for large inputs."""
    orig_shape = x.shape
    orig_dtype = x.dtype
    n = x.size

    # Small-input fast path: launch + DMA-setup overhead dwarfs the work.
    if n < _SMALL_N:
        return jax.nn.sigmoid(x)

    # Lane-dense 2D view: flatten, pad tail to a multiple of _LANES.
    flat = x.reshape(-1)
    pad = (-n) % _LANES
    if pad:
        flat = jnp.pad(flat, (0, pad))
    rows = flat.size // _LANES
    x2 = flat.reshape(rows, _LANES)

    itemsize = jnp.dtype(orig_dtype).itemsize
    # Rows per tile from the byte budget, rounded down to a multiple of 8.
    tr = max(8, (_TILE_BYTES // (_LANES * itemsize)) // 8 * 8)
    tr = min(tr, rows)
    if tr == rows and rows >= 16:
        # Keep at least 2 grid steps so both v7x TensorCores get work.
        tr = max(8, ((rows // 2 + 7) // 8) * 8)
    grid = (pl.cdiv(rows, tr),)

    out = pl.pallas_call(
        _sigmoid_kernel,
        out_shape=jax.ShapeDtypeStruct((rows, _LANES), orig_dtype),
        grid_spec=pltpu.PrefetchScalarGridSpec(
            num_scalar_prefetch=0,
            grid=grid,
            in_specs=[pl.BlockSpec((tr, _LANES), lambda i: (i, 0))],
            out_specs=pl.BlockSpec((tr, _LANES), lambda i: (i, 0)),
        ),
        compiler_params=pltpu.CompilerParams(
            dimension_semantics=("parallel",),
        ),
        cost_estimate=pl.CostEstimate(
            flops=3 * rows * _LANES,
            transcendentals=rows * _LANES,
            bytes_accessed=2 * rows * _LANES * itemsize,
        ),
    )(x2)

    return out.reshape(-1)[:n].reshape(orig_shape)


if __name__ == "__main__":
    key = jax.random.PRNGKey(0)
    k1, k2 = jax.random.split(key)

    # nnodely-style small input (batch=2, window=8, features=32): fast path.
    x_small = jax.random.normal(k1, (2, 8, 32), dtype=jnp.float32)
    y_small = jax.block_until_ready(sigmoid_pallas(x_small))
    ref_small = 1.0 / (1.0 + jnp.exp(-x_small))
    assert y_small.shape == x_small.shape and y_small.dtype == x_small.dtype
    assert jnp.allclose(y_small, ref_small, atol=1e-5, rtol=1e-5)

    # Larger input that exercises the Pallas kernel (lane-dense tiles, grid>=2).
    x_big = jax.random.normal(k2, (4, 256, 512), dtype=jnp.float32)
    y_big = jax.block_until_ready(sigmoid_pallas(x_big))
    ref_big = 1.0 / (1.0 + jnp.exp(-x_big))
    assert y_big.shape == x_big.shape and y_big.dtype == x_big.dtype
    assert jnp.allclose(y_big, ref_big, atol=1e-5, rtol=1e-5)

    print("KERNEL_OK")
</pallas_src>

<mosaic_0001>
module attributes {stable_mosaic.version = 11 : i64} {
  func.func @_sigmoid_kernel(%arg0: i32, %arg1: memref<256x1024xf32, #tpu.memory_space<vmem>>, %arg2: memref<256x1024xf32, #tpu.memory_space<vmem>>) attributes {dimension_semantics = [#tpu.dimension_semantics<parallel>], iteration_bounds = array<i64: 2>, scalar_prefetch = 0 : i64, scratch_operands = 0 : i64, tpu.core_type = #tpu.core_type<tc>, window_params = [{transform_indices = @transform_0, window_bounds = array<i64: 256, 1024>}, {transform_indices = @transform_1, window_bounds = array<i64: 256, 1024>}]} {
    %c0 = arith.constant 0 : index
    %c0_0 = arith.constant 0 : index
    %0 = vector.load %arg1[%c0, %c0_0] : memref<256x1024xf32, #tpu.memory_space<vmem>>, vector<256x1024xf32>
    %cst = arith.constant 5.000000e-01 : f32
    %1 = vector.broadcast %cst : f32 to vector<256x1024xf32>
    %2 = arith.mulf %1, %0 : vector<256x1024xf32>
    %3 = math.tanh %2 : vector<256x1024xf32>
    %cst_1 = arith.constant 5.000000e-01 : f32
    %4 = vector.broadcast %cst_1 : f32 to vector<256x1024xf32>
    %5 = arith.mulf %4, %3 : vector<256x1024xf32>
    %cst_2 = arith.constant 5.000000e-01 : f32
    %6 = vector.broadcast %cst_2 : f32 to vector<256x1024xf32>
    %7 = arith.addf %5, %6 : vector<256x1024xf32>
    %c0_3 = arith.constant 0 : index
    %c0_4 = arith.constant 0 : index
    %8 = vector.load %arg2[%c0_3, %c0_4] : memref<256x1024xf32, #tpu.memory_space<vmem>>, vector<256x1024xf32>
    tpu.vector_store %arg2[%c0_3, %c0_4], %7 {strides = array<i32>} : memref<256x1024xf32, #tpu.memory_space<vmem>>, vector<256x1024xf32>,
    return
  }
  func.func @transform_0(%arg0: i32) -> (i32, i32) {
    %c0_i32 = arith.constant 0 : i32
    %c0_i32_0 = arith.constant 0 : i32
    return %arg0, %c0_i32 : i32, i32
  }
  func.func @transform_1(%arg0: i32) -> (i32, i32) {
    %c0_i32 = arith.constant 0 : i32
    %c0_i32_0 = arith.constant 0 : i32
    return %arg0, %c0_i32 : i32, i32
  }
}

</mosaic_0001>

<bundles_post_ra>
// kernel: tpu_custom_call.1
= control target key start
LH: loop header
LB: loop body
LE: loop exit
PB: predicated region body
PF: predicated region fallthrough
CT: control target
= control target key end

     0   :  { %6 = vsyncpa [#allocation3], 0  ;;  %s3129_s0 = inlined_call_operand.hbm [shape: f32[512,1024], index: 0, kind: input, shape index: {}]   ;;  %s3130_s1 = inlined_call_operand.hbm [shape: f32[512,1024], index: 1, kind: output, shape index: {}]  }
   0x1   :  { %8 = vsyncpa [#allocation3 + $0x1], 0 }
   0x2   :  { %9 = vsyncpa [#allocation4], 0 }
   0x3   :  { %11 = vsyncpa [#allocation4 + $0x1], 0  ;;  %s2454_s6 = smov 0   ;;  %s2456_s7 = smov 0  }
   0x4   :  { %s2458_s8 = smov 0   ;;  %s2460_s9 = smov 0  }
   0x5 LB: > { %s2475_s10 = sadd.s32 4294967295, %s2436_s9   ;;  %s1762_s11 = sadd.s32 4294967294, %s2436_s9   ;;  %s2436_s9 = sphi %s2460_s9, %s3145_s9   ;;  %s2432_s8 = sphi %s2458_s8, %s3144_s8   ;;  %s2428_s7 = sphi %s2456_s7, %s3143_s7   ;;  %s2424_s6 = sphi %s2454_s6, %s3142_s6  }
   0x6   : > { %s2479_s12 = sadd.s32 1, %s2436_s9   ;;  %s24_s13 = sadd.s32 1, %s2432_s8 }
   0x7   : > { %s21_s14 = ssub.s32 %s2436_s9, %s2479_s12  ;;  %p31_p0 = scmp.ne.s32.totalorder %s2432_s8, %s2428_s7 }
   0x8   : > { %p22_p1 = scmp.eq.s32.totalorder %s21_s14, 0  ;;  %p32_p2 = scmp.eq.s32.totalorder %s2436_s9, 0 }
   0x9   : > { %p37_p3 = scmp.ne.s32.totalorder %s2428_s7, %s2424_s6  ;;  %p38_p4 = scmp.eq.s32.totalorder %s2475_s10, 0 }
   0xa   : > { %s2491_s15 = scalar_select %p22_p1, %s2432_s8, %s24_s13  }
   0xb   : > { %p2493_p5 = por %p32_p2, %p31_p0  ;;  %p2497_p6 = por %p38_p4, %p37_p3 }
   0xc   : > { %p61_p7 = scmp.eq.s32.totalorder %s2475_s10, 1  ;;  %p67_p8 = scmp.eq.s32.totalorder %s1762_s11, 1 }
   0xd   : > { %s3134_s17 = scalar_select %p2497_p6, 1, 0 }
   0xe   : > { %p1794_p10 = scmp.lt.s32.totalorder %s2436_s9, 2  ;;  %p2504_p11 = por %p61_p7, %p31_p0 }
   0xf   : > { %p2508_p12 = por %p67_p8, %p37_p3  ;;  %s87_s20 = sand.u32 1, %s2432_s8  }
  0x10   : > { %s3135_s18 = scalar_select %p2504_p11, 1, 0 }
  0x11   : > { %s3136_s19 = scalar_select %p2508_p12, 1, 0 }
  0x12   : > { %s1779_s21 = sshll.u32 %s2436_s9, 15  ;;  %s1765_s22 = sshll.u32 %s87_s20, 11 }
  0x13   : > { %s2517_s25 = scalar_lea.hbm %s3129_s0, %s1779_s21  ;;  %s91_s26 = scalar_lea.vmem [#allocation2], %s1765_s22 }
  0x14   : > { %s99_s27 = sshll.u32 %s91_s26, 4  ;;  %p2521_p13 = pnand %p1794_p10, %p2493_p5  ;;  %s2525_s27 = int_to_ptr.vmem [resolvable:$true] %s99_s27 }
  0x15   : > { %s2527_s29 = scalar_lea.sflag [#allocation3], %s87_s20  ;;  %s2344_s30 = scalar_lea.hbm %s2517_s25, 32768 }
  0x16   : > { %p2345_p0 = scmp.ne.s32.totalorder %s2517_s25, %s2344_s30  ;;  %p2346_p1 = pneg %p2521_p13 }
  0x17   : > { %s2349_s4 = scalar_lea.hbm %s3129_s0, 65536  ;;  %p2350_p4 = scmp.lt.s32.totalorder %s2517_s25, %s3129_s0 }
  0x18   : > { %p2347_p2 = pnand %p2346_p1, %p2345_p0  ;;  %p2351_p5 = scmp.lt.s32.totalorder %s2349_s4, %s2344_s30 }
  0x1a   : > { %p2348_p3 = pneg %p2347_p2  ;;  %p2352_p7 = por %p2351_p5, %p2350_p4 }
  0x1c   : > { %p2353_p8 = pnand %p2352_p7, %p2348_p3 }
  0x1e   : > { %2356 = shalt.err (!%p2353_p8)
}
  0x1f   : > { %s2357_s13 = scalar_lea.vmem %s2525_s27, 32768  ;;  %s2438_s14 = smov [#allocation2]  }
  0x20   : > { %p2358_p10 = scmp.ne.s32.totalorder %s2525_s27, %s2357_s13  ;;  %s2362_s16 = sshll.u32 %s2438_s14, 4  ;;  %s2363_s16 = int_to_ptr.vmem [resolvable:$false] %s2362_s16 }
  0x21   : > { %s2364_s20 = scalar_lea.vmem %s2363_s16, 65536  ;;  %p2365_p2 = scmp.lt.s32.totalorder %s2525_s27, %s2363_s16 }
  0x22   : > { %p2360_p9 = pnand %p2358_p10, %p2346_p1  ;;  %p2366_p12 = scmp.lt.s32.totalorder %s2364_s20, %s2357_s13 }
  0x24   : > { %p2361_p0 = pneg %p2360_p9  ;;  %p2367_p11 = por %p2366_p12, %p2365_p2 }
  0x26   : > { %p2368_p6 = pnand %p2367_p11, %p2361_p0 }
  0x28   : > { %2371 = shalt.err (!%p2368_p6)
}
  0x29   : > { %s2439_s21 = smov 1024   ;;  %s2440_s22 = smov 64  }
  0x2a   : > { %1789 = dma.hbm_to_vmem [thread:$0]  (!%p2521_p13), %s2517_s25, 32768, %s2525_s27, %s2527_s29, %s2439_s21, %s2439_s21, %s2440_s22  }
  0x2b   : > { %p1769_p9 = scmp.ge.s32.totalorder %s2436_s9, 1  ;;  %p107_p1 = scmp.lt.s32.totalorder %s2436_s9, 3 }
  0x2d   : > { %p108_p3 = pnand %p1769_p9, %p107_p1 }
  0x2e   : > { %s2551_s23 = sand.u32 (!%p108_p3), 1, %s2428_s7   ;;  %p3138_p6 = scmp.ne.s32.totalorder (!%p108_p3), %s3134_s17, 0 }
  0x2f   : > { %111 = sbr.rel (%p108_p3) target bundleno = 343 (0x157), region = 24  ;;  %s1770_s24 = sshll.u32 (!%p108_p3), %s2551_s23, 11 }
  0x30   : > { %s114_s26 = scalar_lea.sflag (!%p108_p3), [#allocation3], %s2551_s23  ;;  %s2557_s30 = scalar_lea.vmem (!%p108_p3), [#allocation2], %s1770_s24 }
  0x34   : > { %2415 = dma.done.wait (%p3138_p6), %s114_s26, 32768  }
  0x35   : > { %2417 = vsyncadd (%p3138_p6), %s114_s26, 4294934528  ;;  %v138_v0 = vld [vmem:[%s2557_s30] sm:$0xff]  ;;  %v139_v1 = vld [vmem:[%s2557_s30 + $0x8] sm:$0xff]  ;;  %s2590_s17 = scalar_lea.vmem [#allocation5], %s1770_s24  ;;  %s1781_s25 = sshll.u32 %s2475_s10, 15 }
  0x36   : > { %v140_v2 = vld [vmem:[%s2557_s30 + $0x10] sm:$0xff]  ;;  %v394_v3 = vmul.f32 0.5, %v138_v0  ;;  %v395_v4 = vmul.f32 0.5, %v139_v1  ;;  %v141_v6 = vld [vmem:[%s2557_s30 + $0x18] sm:$0xff]  ;;  %v142_v7 = vld [vmem:[%s2557_s30 + $0x20] sm:$0xff]  ;;  %s1689_s27 = sshll.u32 %s2590_s17, 4  ;;  %s3081_s2 = scalar_lea.hbm %s3130_s1, %s1781_s25  ;;  %s3083_s27 = int_to_ptr.vmem [resolvable:$true] %s1689_s27 }
  0x37   : > { %v396_v5 = vmul.f32 0.5, %v140_v2  ;;  %v143_v8 = vld [vmem:[%s2557_s30 + $0x28] sm:$0xff]  ;;  %v397_v9 = vmul.f32 0.5, %v141_v6  ;;  %v144_v10 = vld [vmem:[%s2557_s30 + $0x30] sm:$0xff]  ;;  %v398_v11 = vmul.f32 0.5, %v142_v7  ;;  %v145_v12 = vld [vmem:[%s2557_s30 + $0x38] sm:$0xff] }
  0x38   : > { %1832 = vtanh.f32 %v394_v3  ;;  %v399_v13 = vmul.f32 0.5, %v143_v8  ;;  %v146_v14 = vld [vmem:[%s2557_s30 + $0x40] sm:$0xff]  ;;  %v400_v15 = vmul.f32 0.5, %v144_v10  ;;  %v147_v16 = vld [vmem:[%s2557_s30 + $0x48] sm:$0xff]  ;;  %v401_v17 = vmul.f32 0.5, %v145_v12  ;;  %v148_v18 = vld [vmem:[%s2557_s30 + $0x50] sm:$0xff] }
  0x39   : > { %1834 = vtanh.f32 %v395_v4  ;;  %v402_v19 = vmul.f32 0.5, %v146_v14  ;;  %v149_v20 = vld [vmem:[%s2557_s30 + $0x58] sm:$0xff]  ;;  %v403_v21 = vmul.f32 0.5, %v147_v16  ;;  %v150_v22 = vld [vmem:[%s2557_s30 + $0x60] sm:$0xff]  ;;  %v404_v23 = vmul.f32 0.5, %v148_v18  ;;  %v151_v24 = vld [vmem:[%s2557_s30 + $0x68] sm:$0xff] }
  0x3a   : > { %1836 = vtanh.f32 %v396_v5  ;;  %v405_v25 = vmul.f32 0.5, %v149_v20  ;;  %v152_v26 = vld [vmem:[%s2557_s30 + $0x70] sm:$0xff]  ;;  %v406_v27 = vmul.f32 0.5, %v150_v22  ;;  %v153_v28 = vld [vmem:[%s2557_s30 + $0x78] sm:$0xff]  ;;  %v407_v29 = vmul.f32 0.5, %v151_v24  ;;  %v154_v30 = vld [vmem:[%s2557_s30 + $0x80] sm:$0xff] }
  0x3b   : > { %1838 = vtanh.f32 %v397_v9  ;;  %v408_v31 = vmul.f32 0.5, %v152_v26  ;;  %v155_v32 = vld [vmem:[%s2557_s30 + $0x88] sm:$0xff]  ;;  %v409_v33 = vmul.f32 0.5, %v153_v28  ;;  %v156_v34 = vld [vmem:[%s2557_s30 + $0x90] sm:$0xff]  ;;  %v410_v35 = vmul.f32 0.5, %v154_v30  ;;  %v157_v36 = vld [vmem:[%s2557_s30 + $0x98] sm:$0xff] }
  0x3c   : > { %1840 = vtanh.f32 %v398_v11  ;;  %v411_v38 = vmul.f32 0.5, %v155_v32  ;;  %v158_v39 = vld [vmem:[%s2557_s30 + $0xa0] sm:$0xff]  ;;  %v412_v42 = vmul.f32 0.5, %v156_v34  ;;  %v159_v43 = vld [vmem:[%s2557_s30 + $0xa8] sm:$0xff]  ;;  %v413_v46 = vmul.f32 0.5, %v157_v36  ;;  %v160_v47 = vld [vmem:[%s2557_s30 + $0xb0] sm:$0xff] }
  0x3d   : > { %1842 = vtanh.f32 %v399_v13  ;;  %v414_v51 = vmul.f32 0.5, %v158_v39  ;;  %v161_v52 = vld [vmem:[%s2557_s30 + $0xb8] sm:$0xff]  ;;  %v415_v56 = vmul.f32 0.5, %v159_v43  ;;  %v162_v57 = vld [vmem:[%s2557_s30 + $0xc0] sm:$0xff]  ;;  %v416_v61 = vmul.f32 0.5, %v160_v47  ;;  %v163_v62 = vld [vmem:[%s2557_s30 + $0xc8] sm:$0xff] }
  0x3e   : > { %1844 = vtanh.f32 %v400_v15  ;;  %v417_v2 = vmul.f32 0.5, %v161_v52  ;;  %v164_v3 = vld [vmem:[%s2557_s30 + $0xd0] sm:$0xff]  ;;  %v418_v7 = vmul.f32 0.5, %v162_v57  ;;  %v165_v8 = vld [vmem:[%s2557_s30 + $0xd8] sm:$0xff]  ;;  %v419_v12 = vmul.f32 0.5, %v163_v62  ;;  %v166_v13 = vld [vmem:[%s2557_s30 + $0xe0] sm:$0xff] }
  0x3f   : > { %1846 = vtanh.f32 %v401_v17  ;;  %v420_v17 = vmul.f32 0.5, %v164_v3  ;;  %v167_v18 = vld [vmem:[%s2557_s30 + $0xe8] sm:$0xff]  ;;  %v421_v22 = vmul.f32 0.5, %v165_v8  ;;  %v169_v28 = vld [vmem:[%s2557_s30 + $0xf8] sm:$0xff]  ;;  %v172_v43 = vld [vmem:[%s2557_s30 + $0x110] sm:$0xff]  ;;  %s1675_s10 = scalar_lea.sflag [#allocation4], %s2551_s23 }
  0x40   : > { %1848 = vtanh.f32 %v402_v19  ;;  %v423_v32 = vmul.f32 0.5, %v167_v18  ;;  %v428_v57 = vmul.f32 0.5, %v172_v43  ;;  %s2372_s3 = scalar_lea.vmem %s3083_s27, 32768  ;;  %p3139_p12 = scmp.ne.s32.totalorder %s3135_s18, 0 }
  0x41   : > { %1850 = vtanh.f32 %v403_v21  ;;  %p2373_p11 = scmp.ne.s32.totalorder %s3083_s27, %s2372_s3  ;;  %s2441_s4 = smov [#allocation5]  }
  0x42   : > { %1852 = vtanh.f32 %v404_v23  ;;  %v168_v23 = vld [vmem:[%s2557_s30 + $0xf0] sm:$0xff]  ;;  %s2376_s5 = sshll.u32 %s2441_s4, 4  ;;  %s2377_s5 = int_to_ptr.vmem [resolvable:$false] %s2376_s5 }
  0x43   : > { %1854 = vtanh.f32 %v405_v25  ;;  %p2374_p13 = pnand %p2373_p11, %p3139_p12  ;;  %s2378_s11 = scalar_lea.vmem %s2377_s5, 65536 }
  0x44   : > { %1856 = vtanh.f32 %v406_v27  ;;  %v422_v27 = vmul.f32 0.5, %v166_v13  ;;  %p2379_p5 = scmp.lt.s32.totalorder %s3083_s27, %s2377_s5  ;;  %p2380_p7 = scmp.lt.s32.totalorder %s2378_s11, %s2372_s3 }
  0x45   : > { %v1833_v37 = vpop.eup %1832  ;;  %1858 = vtanh.f32 %v407_v29  ;;  %p2375_p4 = pneg %p2374_p13 }
  0x46   : > { %v1835_v40 = vpop.eup %1834  ;;  %v906_v41 = vmul.f32 0.5, %v1833_v37  ;;  %1860 = vtanh.f32 %v408_v31  ;;  %v424_v37 = vmul.f32 0.5, %v168_v23  ;;  %p2381_p8 = por %p2380_p7, %p2379_p5 }
  0x47   : > { %v1837_v44 = vpop.eup %1836  ;;  %v907_v45 = vmul.f32 0.5, %v1835_v40  ;;  %1862 = vtanh.f32 %v409_v33  ;;  %v170_v33 = vld [vmem:[%s2557_s30 + $0x100] sm:$0xff] }
  0x48   : > { %v1839_v48 = vpop.eup %1838  ;;  %v1162_v49 = vadd.f32 0.5, %v906_v41  ;;  %v908_v50 = vmul.f32 0.5, %v1837_v44  ;;  %1864 = vtanh.f32 %v410_v35  ;;  %v426_v47 = vmul.f32 0.5, %v170_v33  ;;  %p2382_p10 = pnand %p2381_p8, %p2375_p4 }
  0x49   : > { %v1841_v53 = vpop.eup %1840  ;;  %v1163_v54 = vadd.f32 0.5, %v907_v45  ;;  %v909_v55 = vmul.f32 0.5, %v1839_v48  ;;  %1866 = vtanh.f32 %v411_v38  ;;  %v171_v38 = vld [vmem:[%s2557_s30 + $0x108] sm:$0xff]  ;;  %v173_v48 = vld [vmem:[%s2557_s30 + $0x118] sm:$0xff] }
  0x4a   : > { %v1843_v58 = vpop.eup %1842  ;;  %1418 = vst [vmem:[%s2590_s17] sm:$0xff] %v1162_v49  ;;  %v1164_v59 = vadd.f32 0.5, %v908_v50  ;;  %v910_v60 = vmul.f32 0.5, %v1841_v53  ;;  %1868 = vtanh.f32 %v412_v42  ;;  %v425_v42 = vmul.f32 0.5, %v169_v28  ;;  %v174_v53 = vld [vmem:[%s2557_s30 + $0x120] sm:$0xff] }
  0x4b   : > { %v1845_v63 = vpop.eup %1844  ;;  %1419 = vst [vmem:[%s2590_s17 + $0x8] sm:$0xff] %v1163_v54  ;;  %v1165_v0 = vadd.f32 0.5, %v909_v55  ;;  %v911_v1 = vmul.f32 0.5, %v1843_v58  ;;  %1870 = vtanh.f32 %v413_v46  ;;  %v427_v52 = vmul.f32 0.5, %v171_v38  ;;  %v175_v58 = vld [vmem:[%s2557_s30 + $0x128] sm:$0xff] }
  0x4c   : > { %v1847_v4 = vpop.eup %1846  ;;  %1420 = vst [vmem:[%s2590_s17 + $0x10] sm:$0xff] %v1164_v59  ;;  %v1166_v5 = vadd.f32 0.5, %v910_v60  ;;  %v912_v6 = vmul.f32 0.5, %v1845_v63  ;;  %1872 = vtanh.f32 %v414_v51  ;;  %v429_v62 = vmul.f32 0.5, %v173_v48  ;;  %v176_v63 = vld [vmem:[%s2557_s30 + $0x130] sm:$0xff] }
  0x4d   : > { %v1849_v9 = vpop.eup %1848  ;;  %1421 = vst [vmem:[%s2590_s17 + $0x18] sm:$0xff] %v1165_v0  ;;  %v1167_v10 = vadd.f32 0.5, %v911_v1  ;;  %v913_v11 = vmul.f32 0.5, %v1847_v4  ;;  %1874 = vtanh.f32 %v415_v56  ;;  %v430_v3 = vmul.f32 0.5, %v174_v53  ;;  %v177_v4 = vld [vmem:[%s2557_s30 + $0x138] sm:$0xff] }
  0x4e   : > { %v1851_v14 = vpop.eup %1850  ;;  %1422 = vst [vmem:[%s2590_s17 + $0x20] sm:$0xff] %v1166_v5  ;;  %v1168_v15 = vadd.f32 0.5, %v912_v6  ;;  %v914_v16 = vmul.f32 0.5, %v1849_v9  ;;  %1876 = vtanh.f32 %v416_v61  ;;  %v431_v8 = vmul.f32 0.5, %v175_v58  ;;  %v178_v9 = vld [vmem:[%s2557_s30 + $0x140] sm:$0xff] }
  0x4f   : > { %v1853_v19 = vpop.eup %1852  ;;  %1423 = vst [vmem:[%s2590_s17 + $0x28] sm:$0xff] %v1167_v10  ;;  %v1169_v20 = vadd.f32 0.5, %v913_v11  ;;  %v915_v21 = vmul.f32 0.5, %v1851_v14  ;;  %1878 = vtanh.f32 %v417_v2  ;;  %v432_v13 = vmul.f32 0.5, %v176_v63  ;;  %v179_v14 = vld [vmem:[%s2557_s30 + $0x148] sm:$0xff] }
  0x50   : > { %v1855_v24 = vpop.eup %1854  ;;  %1424 = vst [vmem:[%s2590_s17 + $0x30] sm:$0xff] %v1168_v15  ;;  %v1170_v25 = vadd.f32 0.5, %v914_v16  ;;  %v916_v26 = vmul.f32 0.5, %v1853_v19  ;;  %1880 = vtanh.f32 %v418_v7  ;;  %v433_v18 = vmul.f32 0.5, %v177_v4  ;;  %v180_v19 = vld [vmem:[%s2557_s30 + $0x150] sm:$0xff] }
  0x51   : > { %v1857_v29 = vpop.eup %1856  ;;  %1425 = vst [vmem:[%s2590_s17 + $0x38] sm:$0xff] %v1169_v20  ;;  %v1171_v30 = vadd.f32 0.5, %v915_v21  ;;  %v917_v31 = vmul.f32 0.5, %v1855_v24  ;;  %1882 = vtanh.f32 %v419_v12  ;;  %v434_v23 = vmul.f32 0.5, %v178_v9  ;;  %v181_v24 = vld [vmem:[%s2557_s30 + $0x158] sm:$0xff] }
  0x52   : > { %v1859_v34 = vpop.eup %1858  ;;  %1426 = vst [vmem:[%s2590_s17 + $0x40] sm:$0xff] %v1170_v25  ;;  %v1172_v35 = vadd.f32 0.5, %v916_v26  ;;  %v918_v36 = vmul.f32 0.5, %v1857_v29  ;;  %1884 = vtanh.f32 %v420_v17  ;;  %v435_v28 = vmul.f32 0.5, %v179_v14  ;;  %v182_v29 = vld [vmem:[%s2557_s30 + $0x160] sm:$0xff] }
  0x53   : > { %v1861_v39 = vpop.eup %1860  ;;  %1427 = vst [vmem:[%s2590_s17 + $0x48] sm:$0xff] %v1171_v30  ;;  %v1173_v40 = vadd.f32 0.5, %v917_v31  ;;  %v919_v41 = vmul.f32 0.5, %v1859_v34  ;;  %1886 = vtanh.f32 %v421_v22  ;;  %v436_v33 = vmul.f32 0.5, %v180_v19  ;;  %v183_v34 = vld [vmem:[%s2557_s30 + $0x168] sm:$0xff] }
  0x54   : > { %v1863_v44 = vpop.eup %1862  ;;  %1428 = vst [vmem:[%s2590_s17 + $0x50] sm:$0xff] %v1172_v35  ;;  %v1174_v45 = vadd.f32 0.5, %v918_v36  ;;  %v920_v46 = vmul.f32 0.5, %v1861_v39  ;;  %1888 = vtanh.f32 %v422_v27  ;;  %v437_v38 = vmul.f32 0.5, %v181_v24  ;;  %v184_v39 = vld [vmem:[%s2557_s30 + $0x170] sm:$0xff] }
  0x55   : > { %v1865_v49 = vpop.eup %1864  ;;  %1429 = vst [vmem:[%s2590_s17 + $0x58] sm:$0xff] %v1173_v40  ;;  %v1175_v50 = vadd.f32 0.5, %v919_v41  ;;  %v921_v51 = vmul.f32 0.5, %v1863_v44  ;;  %1890 = vtanh.f32 %v423_v32  ;;  %v438_v43 = vmul.f32 0.5, %v182_v29  ;;  %v185_v44 = vld [vmem:[%s2557_s30 + $0x178] sm:$0xff] }
  0x56   : > { %v1867_v54 = vpop.eup %1866  ;;  %1430 = vst [vmem:[%s2590_s17 + $0x60] sm:$0xff] %v1174_v45  ;;  %v1176_v55 = vadd.f32 0.5, %v920_v46  ;;  %v922_v56 = vmul.f32 0.5, %v1865_v49  ;;  %1892 = vtanh.f32 %v424_v37  ;;  %v439_v48 = vmul.f32 0.5, %v183_v34  ;;  %v186_v49 = vld [vmem:[%s2557_s30 + $0x180] sm:$0xff] }
  0x57   : > { %v1869_v59 = vpop.eup %1868  ;;  %1431 = vst [vmem:[%s2590_s17 + $0x68] sm:$0xff] %v1175_v50  ;;  %v1177_v60 = vadd.f32 0.5, %v921_v51  ;;  %v923_v61 = vmul.f32 0.5, %v1867_v54  ;;  %1894 = vtanh.f32 %v425_v42  ;;  %v440_v53 = vmul.f32 0.5, %v184_v39  ;;  %v187_v54 = vld [vmem:[%s2557_s30 + $0x188] sm:$0xff] }
  0x58   : > { %v1871_v0 = vpop.eup %1870  ;;  %1432 = vst [vmem:[%s2590_s17 + $0x70] sm:$0xff] %v1176_v55  ;;  %v1178_v1 = vadd.f32 0.5, %v922_v56  ;;  %v924_v2 = vmul.f32 0.5, %v1869_v59  ;;  %1896 = vtanh.f32 %v426_v47  ;;  %v441_v58 = vmul.f32 0.5, %v185_v44  ;;  %v188_v59 = vld [vmem:[%s2557_s30 + $0x190] sm:$0xff] }
  0x59   : > { %v1873_v5 = vpop.eup %1872  ;;  %1433 = vst [vmem:[%s2590_s17 + $0x78] sm:$0xff] %v1177_v60  ;;  %v1179_v6 = vadd.f32 0.5, %v923_v61  ;;  %v925_v7 = vmul.f32 0.5, %v1871_v0  ;;  %1898 = vtanh.f32 %v427_v52  ;;  %v442_v63 = vmul.f32 0.5, %v186_v49  ;;  %v189_v0 = vld [vmem:[%s2557_s30 + $0x198] sm:$0xff] }
  0x5a   : > { %v1875_v10 = vpop.eup %1874  ;;  %1434 = vst [vmem:[%s2590_s17 + $0x80] sm:$0xff] %v1178_v1  ;;  %v1180_v11 = vadd.f32 0.5, %v924_v2  ;;  %v926_v12 = vmul.f32 0.5, %v1873_v5  ;;  %1900 = vtanh.f32 %v428_v57  ;;  %v443_v4 = vmul.f32 0.5, %v187_v54  ;;  %v190_v5 = vld [vmem:[%s2557_s30 + $0x1a0] sm:$0xff] }
  0x5b   : > { %v1877_v15 = vpop.eup %1876  ;;  %1435 = vst [vmem:[%s2590_s17 + $0x88] sm:$0xff] %v1179_v6  ;;  %v1181_v16 = vadd.f32 0.5, %v925_v7  ;;  %v927_v17 = vmul.f32 0.5, %v1875_v10  ;;  %1902 = vtanh.f32 %v429_v62  ;;  %v444_v9 = vmul.f32 0.5, %v188_v59  ;;  %v191_v10 = vld [vmem:[%s2557_s30 + $0x1a8] sm:$0xff] }
  0x5c   : > { %v1879_v20 = vpop.eup %1878  ;;  %1436 = vst [vmem:[%s2590_s17 + $0x90] sm:$0xff] %v1180_v11  ;;  %v1182_v21 = vadd.f32 0.5, %v926_v12  ;;  %v928_v22 = vmul.f32 0.5, %v1877_v15  ;;  %1904 = vtanh.f32 %v430_v3  ;;  %v445_v14 = vmul.f32 0.5, %v189_v0  ;;  %v192_v15 = vld [vmem:[%s2557_s30 + $0x1b0] sm:$0xff] }
  0x5d   : > { %v1881_v25 = vpop.eup %1880  ;;  %1437 = vst [vmem:[%s2590_s17 + $0x98] sm:$0xff] %v1181_v16  ;;  %v1183_v26 = vadd.f32 0.5, %v927_v17  ;;  %v929_v27 = vmul.f32 0.5, %v1879_v20  ;;  %1906 = vtanh.f32 %v431_v8  ;;  %v446_v19 = vmul.f32 0.5, %v190_v5  ;;  %v193_v20 = vld [vmem:[%s2557_s30 + $0x1b8] sm:$0xff] }
  0x5e   : > { %v1883_v30 = vpop.eup %1882  ;;  %1438 = vst [vmem:[%s2590_s17 + $0xa0] sm:$0xff] %v1182_v21  ;;  %v1184_v31 = vadd.f32 0.5, %v928_v22  ;;  %v930_v32 = vmul.f32 0.5, %v1881_v25  ;;  %1908 = vtanh.f32 %v432_v13  ;;  %v447_v24 = vmul.f32 0.5, %v191_v10  ;;  %v194_v25 = vld [vmem:[%s2557_s30 + $0x1c0] sm:$0xff] }
  0x5f   : > { %v1885_v35 = vpop.eup %1884  ;;  %1439 = vst [vmem:[%s2590_s17 + $0xa8] sm:$0xff] %v1183_v26  ;;  %v1185_v36 = vadd.f32 0.5, %v929_v27  ;;  %v931_v37 = vmul.f32 0.5, %v1883_v30  ;;  %1910 = vtanh.f32 %v433_v18  ;;  %v448_v29 = vmul.f32 0.5, %v192_v15  ;;  %v195_v30 = vld [vmem:[%s2557_s30 + $0x1c8] sm:$0xff] }
  0x60   : > { %v1887_v40 = vpop.eup %1886  ;;  %1440 = vst [vmem:[%s2590_s17 + $0xb0] sm:$0xff] %v1184_v31  ;;  %v1186_v41 = vadd.f32 0.5, %v930_v32  ;;  %v932_v42 = vmul.f32 0.5, %v1885_v35  ;;  %1912 = vtanh.f32 %v434_v23  ;;  %v449_v34 = vmul.f32 0.5, %v193_v20  ;;  %v196_v35 = vld [vmem:[%s2557_s30 + $0x1d0] sm:$0xff] }
  0x61   : > { %v1889_v45 = vpop.eup %1888  ;;  %1441 = vst [vmem:[%s2590_s17 + $0xb8] sm:$0xff] %v1185_v36  ;;  %v1187_v46 = vadd.f32 0.5, %v931_v37  ;;  %v933_v47 = vmul.f32 0.5, %v1887_v40  ;;  %1914 = vtanh.f32 %v435_v28  ;;  %v450_v39 = vmul.f32 0.5, %v194_v25  ;;  %v197_v40 = vld [vmem:[%s2557_s30 + $0x1d8] sm:$0xff] }
  0x62   : > { %v1891_v50 = vpop.eup %1890  ;;  %1442 = vst [vmem:[%s2590_s17 + $0xc0] sm:$0xff] %v1186_v41  ;;  %v1188_v51 = vadd.f32 0.5, %v932_v42  ;;  %v934_v52 = vmul.f32 0.5, %v1889_v45  ;;  %1916 = vtanh.f32 %v436_v33  ;;  %v451_v44 = vmul.f32 0.5, %v195_v30  ;;  %v198_v45 = vld [vmem:[%s2557_s30 + $0x1e0] sm:$0xff] }
  0x63   : > { %v1893_v55 = vpop.eup %1892  ;;  %1443 = vst [vmem:[%s2590_s17 + $0xc8] sm:$0xff] %v1187_v46  ;;  %v1189_v56 = vadd.f32 0.5, %v933_v47  ;;  %v935_v57 = vmul.f32 0.5, %v1891_v50  ;;  %1918 = vtanh.f32 %v437_v38  ;;  %v452_v49 = vmul.f32 0.5, %v196_v35  ;;  %v199_v50 = vld [vmem:[%s2557_s30 + $0x1e8] sm:$0xff] }
  0x64   : > { %v1895_v60 = vpop.eup %1894  ;;  %1444 = vst [vmem:[%s2590_s17 + $0xd0] sm:$0xff] %v1188_v51  ;;  %v1190_v61 = vadd.f32 0.5, %v934_v52  ;;  %v936_v62 = vmul.f32 0.5, %v1893_v55  ;;  %1920 = vtanh.f32 %v438_v43  ;;  %v453_v54 = vmul.f32 0.5, %v197_v40  ;;  %v200_v55 = vld [vmem:[%s2557_s30 + $0x1f0] sm:$0xff] }
  0x65   : > { %v1897_v1 = vpop.eup %1896  ;;  %1445 = vst [vmem:[%s2590_s17 + $0xd8] sm:$0xff] %v1189_v56  ;;  %v1191_v2 = vadd.f32 0.5, %v935_v57  ;;  %v937_v3 = vmul.f32 0.5, %v1895_v60  ;;  %1922 = vtanh.f32 %v439_v48  ;;  %v454_v59 = vmul.f32 0.5, %v198_v45  ;;  %v201_v60 = vld [vmem:[%s2557_s30 + $0x1f8] sm:$0xff] }
  0x66   : > { %v1899_v6 = vpop.eup %1898  ;;  %1446 = vst [vmem:[%s2590_s17 + $0xe0] sm:$0xff] %v1190_v61  ;;  %v1192_v7 = vadd.f32 0.5, %v936_v62  ;;  %v938_v8 = vmul.f32 0.5, %v1897_v1  ;;  %1924 = vtanh.f32 %v440_v53  ;;  %v455_v0 = vmul.f32 0.5, %v199_v50  ;;  %v202_v1 = vld [vmem:[%s2557_s30 + $0x200] sm:$0xff] }
  0x67   : > { %v1901_v11 = vpop.eup %1900  ;;  %1447 = vst [vmem:[%s2590_s17 + $0xe8] sm:$0xff] %v1191_v2  ;;  %v1193_v12 = vadd.f32 0.5, %v937_v3  ;;  %v939_v13 = vmul.f32 0.5, %v1899_v6  ;;  %1926 = vtanh.f32 %v441_v58  ;;  %v456_v5 = vmul.f32 0.5, %v200_v55  ;;  %v203_v6 = vld [vmem:[%s2557_s30 + $0x208] sm:$0xff] }
  0x68   : > { %v1903_v16 = vpop.eup %1902  ;;  %1448 = vst [vmem:[%s2590_s17 + $0xf0] sm:$0xff] %v1192_v7  ;;  %v1194_v17 = vadd.f32 0.5, %v938_v8  ;;  %v940_v18 = vmul.f32 0.5, %v1901_v11  ;;  %1928 = vtanh.f32 %v442_v63  ;;  %v457_v10 = vmul.f32 0.5, %v201_v60  ;;  %v204_v11 = vld [vmem:[%s2557_s30 + $0x210] sm:$0xff] }
  0x69   : > { %v1905_v21 = vpop.eup %1904  ;;  %1449 = vst [vmem:[%s2590_s17 + $0xf8] sm:$0xff] %v1193_v12  ;;  %v1195_v22 = vadd.f32 0.5, %v939_v13  ;;  %v941_v23 = vmul.f32 0.5, %v1903_v16  ;;  %1930 = vtanh.f32 %v443_v4  ;;  %v458_v15 = vmul.f32 0.5, %v202_v1  ;;  %v205_v16 = vld [vmem:[%s2557_s30 + $0x218] sm:$0xff] }
  0x6a   : > { %v1907_v26 = vpop.eup %1906  ;;  %1450 = vst [vmem:[%s2590_s17 + $0x100] sm:$0xff] %v1194_v17  ;;  %v1196_v27 = vadd.f32 0.5, %v940_v18  ;;  %v942_v28 = vmul.f32 0.5, %v1905_v21  ;;  %1932 = vtanh.f32 %v444_v9  ;;  %v459_v20 = vmul.f32 0.5, %v203_v6  ;;  %v206_v21 = vld [vmem:[%s2557_s30 + $0x220] sm:$0xff] }
  0x6b   : > { %v1909_v31 = vpop.eup %1908  ;;  %1451 = vst [vmem:[%s2590_s17 + $0x108] sm:$0xff] %v1195_v22  ;;  %v1197_v32 = vadd.f32 0.5, %v941_v23  ;;  %v943_v33 = vmul.f32 0.5, %v1907_v26  ;;  %1934 = vtanh.f32 %v445_v14  ;;  %v460_v25 = vmul.f32 0.5, %v204_v11  ;;  %v207_v26 = vld [vmem:[%s2557_s30 + $0x228] sm:$0xff] }
  0x6c   : > { %v1911_v36 = vpop.eup %1910  ;;  %1452 = vst [vmem:[%s2590_s17 + $0x110] sm:$0xff] %v1196_v27  ;;  %v1198_v37 = vadd.f32 0.5, %v942_v28  ;;  %v944_v38 = vmul.f32 0.5, %v1909_v31  ;;  %1936 = vtanh.f32 %v446_v19  ;;  %v461_v30 = vmul.f32 0.5, %v205_v16  ;;  %v208_v31 = vld [vmem:[%s2557_s30 + $0x230] sm:$0xff] }
  0x6d   : > { %v1913_v41 = vpop.eup %1912  ;;  %1453 = vst [vmem:[%s2590_s17 + $0x118] sm:$0xff] %v1197_v32  ;;  %v1199_v42 = vadd.f32 0.5, %v943_v33  ;;  %v945_v43 = vmul.f32 0.5, %v1911_v36  ;;  %1938 = vtanh.f32 %v447_v24  ;;  %v462_v35 = vmul.f32 0.5, %v206_v21  ;;  %v209_v36 = vld [vmem:[%s2557_s30 + $0x238] sm:$0xff] }
  0x6e   : > { %v1915_v46 = vpop.eup %1914  ;;  %1454 = vst [vmem:[%s2590_s17 + $0x120] sm:$0xff] %v1198_v37  ;;  %v1200_v47 = vadd.f32 0.5, %v944_v38  ;;  %v946_v48 = vmul.f32 0.5, %v1913_v41  ;;  %1940 = vtanh.f32 %v448_v29  ;;  %v463_v40 = vmul.f32 0.5, %v207_v26  ;;  %v210_v41 = vld [vmem:[%s2557_s30 + $0x240] sm:$0xff] }
  0x6f   : > { %v1917_v51 = vpop.eup %1916  ;;  %1455 = vst [vmem:[%s2590_s17 + $0x128] sm:$0xff] %v1199_v42  ;;  %v1201_v52 = vadd.f32 0.5, %v945_v43  ;;  %v947_v53 = vmul.f32 0.5, %v1915_v46  ;;  %1942 = vtanh.f32 %v449_v34  ;;  %v464_v45 = vmul.f32 0.5, %v208_v31  ;;  %v211_v46 = vld [vmem:[%s2557_s30 + $0x248] sm:$0xff] }
  0x70   : > { %v1919_v56 = vpop.eup %1918  ;;  %1456 = vst [vmem:[%s2590_s17 + $0x130] sm:$0xff] %v1200_v47  ;;  %v1202_v57 = vadd.f32 0.5, %v946_v48  ;;  %v948_v58 = vmul.f32 0.5, %v1917_v51  ;;  %1944 = vtanh.f32 %v450_v39  ;;  %v465_v50 = vmul.f32 0.5, %v209_v36  ;;  %v212_v51 = vld [vmem:[%s2557_s30 + $0x250] sm:$0xff] }
  0x71   : > { %v1921_v61 = vpop.eup %1920  ;;  %1457 = vst [vmem:[%s2590_s17 + $0x138] sm:$0xff] %v1201_v52  ;;  %v1203_v62 = vadd.f32 0.5, %v947_v53  ;;  %v949_v63 = vmul.f32 0.5, %v1919_v56  ;;  %1946 = vtanh.f32 %v451_v44  ;;  %v466_v55 = vmul.f32 0.5, %v210_v41  ;;  %v213_v56 = vld [vmem:[%s2557_s30 + $0x258] sm:$0xff] }
  0x72   : > { %v1923_v2 = vpop.eup %1922  ;;  %1458 = vst [vmem:[%s2590_s17 + $0x140] sm:$0xff] %v1202_v57  ;;  %v1204_v3 = vadd.f32 0.5, %v948_v58  ;;  %v950_v4 = vmul.f32 0.5, %v1921_v61  ;;  %1948 = vtanh.f32 %v452_v49  ;;  %v467_v60 = vmul.f32 0.5, %v211_v46  ;;  %v214_v61 = vld [vmem:[%s2557_s30 + $0x260] sm:$0xff] }
  0x73   : > { %v1925_v7 = vpop.eup %1924  ;;  %1459 = vst [vmem:[%s2590_s17 + $0x148] sm:$0xff] %v1203_v62  ;;  %v1205_v8 = vadd.f32 0.5, %v949_v63  ;;  %v951_v9 = vmul.f32 0.5, %v1923_v2  ;;  %1950 = vtanh.f32 %v453_v54  ;;  %v468_v1 = vmul.f32 0.5, %v212_v51  ;;  %v215_v2 = vld [vmem:[%s2557_s30 + $0x268] sm:$0xff] }
  0x74   : > { %v1927_v12 = vpop.eup %1926  ;;  %1460 = vst [vmem:[%s2590_s17 + $0x150] sm:$0xff] %v1204_v3  ;;  %v1206_v13 = vadd.f32 0.5, %v950_v4  ;;  %v952_v14 = vmul.f32 0.5, %v1925_v7  ;;  %1952 = vtanh.f32 %v454_v59  ;;  %v469_v6 = vmul.f32 0.5, %v213_v56  ;;  %v216_v7 = vld [vmem:[%s2557_s30 + $0x270] sm:$0xff] }
  0x75   : > { %v1929_v17 = vpop.eup %1928  ;;  %1461 = vst [vmem:[%s2590_s17 + $0x158] sm:$0xff] %v1205_v8  ;;  %v1207_v18 = vadd.f32 0.5, %v951_v9  ;;  %v953_v19 = vmul.f32 0.5, %v1927_v12  ;;  %1954 = vtanh.f32 %v455_v0  ;;  %v470_v11 = vmul.f32 0.5, %v214_v61  ;;  %v217_v12 = vld [vmem:[%s2557_s30 + $0x278] sm:$0xff] }
  0x76   : > { %v1931_v22 = vpop.eup %1930  ;;  %1462 = vst [vmem:[%s2590_s17 + $0x160] sm:$0xff] %v1206_v13  ;;  %v1208_v23 = vadd.f32 0.5, %v952_v14  ;;  %v954_v24 = vmul.f32 0.5, %v1929_v17  ;;  %1956 = vtanh.f32 %v456_v5  ;;  %v471_v16 = vmul.f32 0.5, %v215_v2  ;;  %v218_v17 = vld [vmem:[%s2557_s30 + $0x280] sm:$0xff] }
  0x77   : > { %v1933_v27 = vpop.eup %1932  ;;  %1463 = vst [vmem:[%s2590_s17 + $0x168] sm:$0xff] %v1207_v18  ;;  %v1209_v28 = vadd.f32 0.5, %v953_v19  ;;  %v955_v29 = vmul.f32 0.5, %v1931_v22  ;;  %1958 = vtanh.f32 %v457_v10  ;;  %v472_v21 = vmul.f32 0.5, %v216_v7  ;;  %v219_v22 = vld [vmem:[%s2557_s30 + $0x288] sm:$0xff] }
  0x78   : > { %v1935_v32 = vpop.eup %1934  ;;  %1464 = vst [vmem:[%s2590_s17 + $0x170] sm:$0xff] %v1208_v23  ;;  %v1210_v33 = vadd.f32 0.5, %v954_v24  ;;  %v956_v34 = vmul.f32 0.5, %v1933_v27  ;;  %1960 = vtanh.f32 %v458_v15  ;;  %v473_v26 = vmul.f32 0.5, %v217_v12  ;;  %v220_v27 = vld [vmem:[%s2557_s30 + $0x290] sm:$0xff] }
  0x79   : > { %v1937_v37 = vpop.eup %1936  ;;  %1465 = vst [vmem:[%s2590_s17 + $0x178] sm:$0xff] %v1209_v28  ;;  %v1211_v38 = vadd.f32 0.5, %v955_v29  ;;  %v957_v39 = vmul.f32 0.5, %v1935_v32  ;;  %1962 = vtanh.f32 %v459_v20  ;;  %v474_v31 = vmul.f32 0.5, %v218_v17  ;;  %v221_v32 = vld [vmem:[%s2557_s30 + $0x298] sm:$0xff] }
  0x7a   : > { %v1939_v42 = vpop.eup %1938  ;;  %1466 = vst [vmem:[%s2590_s17 + $0x180] sm:$0xff] %v1210_v33  ;;  %v1212_v43 = vadd.f32 0.5, %v956_v34  ;;  %v958_v44 = vmul.f32 0.5, %v1937_v37  ;;  %1964 = vtanh.f32 %v460_v25  ;;  %v475_v36 = vmul.f32 0.5, %v219_v22  ;;  %v222_v37 = vld [vmem:[%s2557_s30 + $0x2a0] sm:$0xff] }
  0x7b   : > { %v1941_v47 = vpop.eup %1940  ;;  %1467 = vst [vmem:[%s2590_s17 + $0x188] sm:$0xff] %v1211_v38  ;;  %v1213_v48 = vadd.f32 0.5, %v957_v39  ;;  %v959_v49 = vmul.f32 0.5, %v1939_v42  ;;  %1966 = vtanh.f32 %v461_v30  ;;  %v476_v41 = vmul.f32 0.5, %v220_v27  ;;  %v223_v42 = vld [vmem:[%s2557_s30 + $0x2a8] sm:$0xff] }
  0x7c   : > { %v1943_v52 = vpop.eup %1942  ;;  %1468 = vst [vmem:[%s2590_s17 + $0x190] sm:$0xff] %v1212_v43  ;;  %v1214_v53 = vadd.f32 0.5, %v958_v44  ;;  %v960_v54 = vmul.f32 0.5, %v1941_v47  ;;  %1968 = vtanh.f32 %v462_v35  ;;  %v477_v46 = vmul.f32 0.5, %v221_v32  ;;  %v224_v47 = vld [vmem:[%s2557_s30 + $0x2b0] sm:$0xff] }
  0x7d   : > { %v1945_v57 = vpop.eup %1944  ;;  %1469 = vst [vmem:[%s2590_s17 + $0x198] sm:$0xff] %v1213_v48  ;;  %v1215_v58 = vadd.f32 0.5, %v959_v49  ;;  %v961_v59 = vmul.f32 0.5, %v1943_v52  ;;  %1970 = vtanh.f32 %v463_v40  ;;  %v478_v51 = vmul.f32 0.5, %v222_v37  ;;  %v225_v52 = vld [vmem:[%s2557_s30 + $0x2b8] sm:$0xff] }
  0x7e   : > { %v1947_v62 = vpop.eup %1946  ;;  %1470 = vst [vmem:[%s2590_s17 + $0x1a0] sm:$0xff] %v1214_v53  ;;  %v1216_v63 = vadd.f32 0.5, %v960_v54  ;;  %v962_v0 = vmul.f32 0.5, %v1945_v57  ;;  %1972 = vtanh.f32 %v464_v45  ;;  %v479_v56 = vmul.f32 0.5, %v223_v42  ;;  %v226_v57 = vld [vmem:[%s2557_s30 + $0x2c0] sm:$0xff] }
  0x7f   : > { %v1949_v3 = vpop.eup %1948  ;;  %1471 = vst [vmem:[%s2590_s17 + $0x1a8] sm:$0xff] %v1215_v58  ;;  %v1217_v4 = vadd.f32 0.5, %v961_v59  ;;  %v963_v5 = vmul.f32 0.5, %v1947_v62  ;;  %1974 = vtanh.f32 %v465_v50  ;;  %v480_v61 = vmul.f32 0.5, %v224_v47  ;;  %v227_v62 = vld [vmem:[%s2557_s30 + $0x2c8] sm:$0xff] }
  0x80   : > { %v1951_v8 = vpop.eup %1950  ;;  %1472 = vst [vmem:[%s2590_s17 + $0x1b0] sm:$0xff] %v1216_v63  ;;  %v1218_v9 = vadd.f32 0.5, %v962_v0  ;;  %v964_v10 = vmul.f32 0.5, %v1949_v3  ;;  %1976 = vtanh.f32 %v466_v55  ;;  %v481_v2 = vmul.f32 0.5, %v225_v52  ;;  %v228_v3 = vld [vmem:[%s2557_s30 + $0x2d0] sm:$0xff] }
  0x81   : > { %v1953_v13 = vpop.eup %1952  ;;  %1473 = vst [vmem:[%s2590_s17 + $0x1b8] sm:$0xff] %v1217_v4  ;;  %v1219_v14 = vadd.f32 0.5, %v963_v5  ;;  %v965_v15 = vmul.f32 0.5, %v1951_v8  ;;  %1978 = vtanh.f32 %v467_v60  ;;  %v482_v7 = vmul.f32 0.5, %v226_v57  ;;  %v229_v8 = vld [vmem:[%s2557_s30 + $0x2d8] sm:$0xff] }
  0x82   : > { %v1955_v18 = vpop.eup %1954  ;;  %1474 = vst [vmem:[%s2590_s17 + $0x1c0] sm:$0xff] %v1218_v9  ;;  %v1220_v19 = vadd.f32 0.5, %v964_v10  ;;  %v966_v20 = vmul.f32 0.5, %v1953_v13  ;;  %1980 = vtanh.f32 %v468_v1  ;;  %v483_v12 = vmul.f32 0.5, %v227_v62  ;;  %v230_v13 = vld [vmem:[%s2557_s30 + $0x2e0] sm:$0xff] }
  0x83   : > { %v1957_v23 = vpop.eup %1956  ;;  %1475 = vst [vmem:[%s2590_s17 + $0x1c8] sm:$0xff] %v1219_v14  ;;  %v1221_v24 = vadd.f32 0.5, %v965_v15  ;;  %v967_v25 = vmul.f32 0.5, %v1955_v18  ;;  %1982 = vtanh.f32 %v469_v6  ;;  %v484_v17 = vmul.f32 0.5, %v228_v3  ;;  %v231_v18 = vld [vmem:[%s2557_s30 + $0x2e8] sm:$0xff] }
  0x84   : > { %v1959_v28 = vpop.eup %1958  ;;  %1476 = vst [vmem:[%s2590_s17 + $0x1d0] sm:$0xff] %v1220_v19  ;;  %v1222_v29 = vadd.f32 0.5, %v966_v20  ;;  %v968_v30 = vmul.f32 0.5, %v1957_v23  ;;  %1984 = vtanh.f32 %v470_v11  ;;  %v485_v22 = vmul.f32 0.5, %v229_v8  ;;  %v232_v23 = vld [vmem:[%s2557_s30 + $0x2f0] sm:$0xff] }
  0x85   : > { %v1961_v33 = vpop.eup %1960  ;;  %1477 = vst [vmem:[%s2590_s17 + $0x1d8] sm:$0xff] %v1221_v24  ;;  %v1223_v34 = vadd.f32 0.5, %v967_v25  ;;  %v969_v35 = vmul.f32 0.5, %v1959_v28  ;;  %1986 = vtanh.f32 %v471_v16  ;;  %v486_v27 = vmul.f32 0.5, %v230_v13  ;;  %v233_v28 = vld [vmem:[%s2557_s30 + $0x2f8] sm:$0xff] }
  0x86   : > { %v1963_v38 = vpop.eup %1962  ;;  %1478 = vst [vmem:[%s2590_s17 + $0x1e0] sm:$0xff] %v1222_v29  ;;  %v1224_v39 = vadd.f32 0.5, %v968_v30  ;;  %v970_v40 = vmul.f32 0.5, %v1961_v33  ;;  %1988 = vtanh.f32 %v472_v21  ;;  %v487_v32 = vmul.f32 0.5, %v231_v18  ;;  %v234_v33 = vld [vmem:[%s2557_s30 + $0x300] sm:$0xff] }
  0x87   : > { %v1965_v43 = vpop.eup %1964  ;;  %1479 = vst [vmem:[%s2590_s17 + $0x1e8] sm:$0xff] %v1223_v34  ;;  %v1225_v44 = vadd.f32 0.5, %v969_v35  ;;  %v971_v45 = vmul.f32 0.5, %v1963_v38  ;;  %1990 = vtanh.f32 %v473_v26  ;;  %v488_v37 = vmul.f32 0.5, %v232_v23  ;;  %v235_v38 = vld [vmem:[%s2557_s30 + $0x308] sm:$0xff] }
  0x88   : > { %v1967_v48 = vpop.eup %1966  ;;  %1480 = vst [vmem:[%s2590_s17 + $0x1f0] sm:$0xff] %v1224_v39  ;;  %v1226_v49 = vadd.f32 0.5, %v970_v40  ;;  %v972_v50 = vmul.f32 0.5, %v1965_v43  ;;  %1992 = vtanh.f32 %v474_v31  ;;  %v489_v42 = vmul.f32 0.5, %v233_v28  ;;  %v236_v43 = vld [vmem:[%s2557_s30 + $0x310] sm:$0xff] }
  0x89   : > { %v1969_v53 = vpop.eup %1968  ;;  %1481 = vst [vmem:[%s2590_s17 + $0x1f8] sm:$0xff] %v1225_v44  ;;  %v1227_v54 = vadd.f32 0.5, %v971_v45  ;;  %v973_v55 = vmul.f32 0.5, %v1967_v48  ;;  %1994 = vtanh.f32 %v475_v36  ;;  %v490_v47 = vmul.f32 0.5, %v234_v33  ;;  %v237_v48 = vld [vmem:[%s2557_s30 + $0x318] sm:$0xff] }
  0x8a   : > { %v1971_v58 = vpop.eup %1970  ;;  %1482 = vst [vmem:[%s2590_s17 + $0x200] sm:$0xff] %v1226_v49  ;;  %v1228_v59 = vadd.f32 0.5, %v972_v50  ;;  %v974_v60 = vmul.f32 0.5, %v1969_v53  ;;  %1996 = vtanh.f32 %v476_v41  ;;  %v491_v52 = vmul.f32 0.5, %v235_v38  ;;  %v238_v53 = vld [vmem:[%s2557_s30 + $0x320] sm:$0xff] }
  0x8b   : > { %v1973_v63 = vpop.eup %1972  ;;  %1483 = vst [vmem:[%s2590_s17 + $0x208] sm:$0xff] %v1227_v54  ;;  %v1229_v0 = vadd.f32 0.5, %v973_v55  ;;  %v975_v1 = vmul.f32 0.5, %v1971_v58  ;;  %1998 = vtanh.f32 %v477_v46  ;;  %v492_v57 = vmul.f32 0.5, %v236_v43  ;;  %v239_v58 = vld [vmem:[%s2557_s30 + $0x328] sm:$0xff] }
  0x8c   : > { %v1975_v4 = vpop.eup %1974  ;;  %1484 = vst [vmem:[%s2590_s17 + $0x210] sm:$0xff] %v1228_v59  ;;  %v1230_v5 = vadd.f32 0.5, %v974_v60  ;;  %v976_v6 = vmul.f32 0.5, %v1973_v63  ;;  %2000 = vtanh.f32 %v478_v51  ;;  %v493_v62 = vmul.f32 0.5, %v237_v48  ;;  %v240_v63 = vld [vmem:[%s2557_s30 + $0x330] sm:$0xff] }
  0x8d   : > { %v1977_v9 = vpop.eup %1976  ;;  %1485 = vst [vmem:[%s2590_s17 + $0x218] sm:$0xff] %v1229_v0  ;;  %v1231_v10 = vadd.f32 0.5, %v975_v1  ;;  %v977_v11 = vmul.f32 0.5, %v1975_v4  ;;  %2002 = vtanh.f32 %v479_v56  ;;  %v494_v3 = vmul.f32 0.5, %v238_v53  ;;  %v241_v4 = vld [vmem:[%s2557_s30 + $0x338] sm:$0xff] }
  0x8e   : > { %v1979_v14 = vpop.eup %1978  ;;  %1486 = vst [vmem:[%s2590_s17 + $0x220] sm:$0xff] %v1230_v5  ;;  %v1232_v15 = vadd.f32 0.5, %v976_v6  ;;  %v978_v16 = vmul.f32 0.5, %v1977_v9  ;;  %2004 = vtanh.f32 %v480_v61  ;;  %v495_v8 = vmul.f32 0.5, %v239_v58  ;;  %v242_v9 = vld [vmem:[%s2557_s30 + $0x340] sm:$0xff] }
  0x8f   : > { %v1981_v19 = vpop.eup %1980  ;;  %1487 = vst [vmem:[%s2590_s17 + $0x228] sm:$0xff] %v1231_v10  ;;  %v1233_v20 = vadd.f32 0.5, %v977_v11  ;;  %v979_v21 = vmul.f32 0.5, %v1979_v14  ;;  %2006 = vtanh.f32 %v481_v2  ;;  %v496_v13 = vmul.f32 0.5, %v240_v63  ;;  %v243_v14 = vld [vmem:[%s2557_s30 + $0x348] sm:$0xff] }
  0x90   : > { %v1983_v24 = vpop.eup %1982  ;;  %1488 = vst [vmem:[%s2590_s17 + $0x230] sm:$0xff] %v1232_v15  ;;  %v1234_v25 = vadd.f32 0.5, %v978_v16  ;;  %v980_v26 = vmul.f32 0.5, %v1981_v19  ;;  %2008 = vtanh.f32 %v482_v7  ;;  %v497_v18 = vmul.f32 0.5, %v241_v4  ;;  %v244_v19 = vld [vmem:[%s2557_s30 + $0x350] sm:$0xff] }
  0x91   : > { %v1985_v29 = vpop.eup %1984  ;;  %1489 = vst [vmem:[%s2590_s17 + $0x238] sm:$0xff] %v1233_v20  ;;  %v1235_v30 = vadd.f32 0.5, %v979_v21  ;;  %v981_v31 = vmul.f32 0.5, %v1983_v24  ;;  %2010 = vtanh.f32 %v483_v12  ;;  %v498_v23 = vmul.f32 0.5, %v242_v9  ;;  %v245_v24 = vld [vmem:[%s2557_s30 + $0x358] sm:$0xff] }
  0x92   : > { %v1987_v34 = vpop.eup %1986  ;;  %1490 = vst [vmem:[%s2590_s17 + $0x240] sm:$0xff] %v1234_v25  ;;  %v1236_v35 = vadd.f32 0.5, %v980_v26  ;;  %v982_v36 = vmul.f32 0.5, %v1985_v29  ;;  %2012 = vtanh.f32 %v484_v17  ;;  %v499_v28 = vmul.f32 0.5, %v243_v14  ;;  %v246_v29 = vld [vmem:[%s2557_s30 + $0x360] sm:$0xff] }
  0x93   : > { %v1989_v39 = vpop.eup %1988  ;;  %1491 = vst [vmem:[%s2590_s17 + $0x248] sm:$0xff] %v1235_v30  ;;  %v1237_v40 = vadd.f32 0.5, %v981_v31  ;;  %v983_v41 = vmul.f32 0.5, %v1987_v34  ;;  %2014 = vtanh.f32 %v485_v22  ;;  %v500_v33 = vmul.f32 0.5, %v244_v19  ;;  %v247_v34 = vld [vmem:[%s2557_s30 + $0x368] sm:$0xff] }
  0x94   : > { %v1991_v44 = vpop.eup %1990  ;;  %1492 = vst [vmem:[%s2590_s17 + $0x250] sm:$0xff] %v1236_v35  ;;  %v1238_v45 = vadd.f32 0.5, %v982_v36  ;;  %v984_v46 = vmul.f32 0.5, %v1989_v39  ;;  %2016 = vtanh.f32 %v486_v27  ;;  %v501_v38 = vmul.f32 0.5, %v245_v24  ;;  %v248_v39 = vld [vmem:[%s2557_s30 + $0x370] sm:$0xff] }
  0x95   : > { %v1993_v49 = vpop.eup %1992  ;;  %1493 = vst [vmem:[%s2590_s17 + $0x258] sm:$0xff] %v1237_v40  ;;  %v1239_v50 = vadd.f32 0.5, %v983_v41  ;;  %v985_v51 = vmul.f32 0.5, %v1991_v44  ;;  %2018 = vtanh.f32 %v487_v32  ;;  %v502_v43 = vmul.f32 0.5, %v246_v29  ;;  %v249_v44 = vld [vmem:[%s2557_s30 + $0x378] sm:$0xff] }
  0x96   : > { %v1995_v54 = vpop.eup %1994  ;;  %1494 = vst [vmem:[%s2590_s17 + $0x260] sm:$0xff] %v1238_v45  ;;  %v1240_v55 = vadd.f32 0.5, %v984_v46  ;;  %v986_v56 = vmul.f32 0.5, %v1993_v49  ;;  %2020 = vtanh.f32 %v488_v37  ;;  %v503_v48 = vmul.f32 0.5, %v247_v34  ;;  %v250_v49 = vld [vmem:[%s2557_s30 + $0x380] sm:$0xff] }
  0x97   : > { %v1997_v59 = vpop.eup %1996  ;;  %1495 = vst [vmem:[%s2590_s17 + $0x268] sm:$0xff] %v1239_v50  ;;  %v1241_v60 = vadd.f32 0.5, %v985_v51  ;;  %v987_v61 = vmul.f32 0.5, %v1995_v54  ;;  %2022 = vtanh.f32 %v489_v42  ;;  %v504_v53 = vmul.f32 0.5, %v248_v39  ;;  %v251_v54 = vld [vmem:[%s2557_s30 + $0x388] sm:$0xff] }
  0x98   : > { %v1999_v0 = vpop.eup %1998  ;;  %1496 = vst [vmem:[%s2590_s17 + $0x270] sm:$0xff] %v1240_v55  ;;  %v1242_v1 = vadd.f32 0.5, %v986_v56  ;;  %v988_v2 = vmul.f32 0.5, %v1997_v59  ;;  %2024 = vtanh.f32 %v490_v47  ;;  %v505_v58 = vmul.f32 0.5, %v249_v44  ;;  %v252_v59 = vld [vmem:[%s2557_s30 + $0x390] sm:$0xff] }
  0x99   : > { %v2001_v5 = vpop.eup %2000  ;;  %1497 = vst [vmem:[%s2590_s17 + $0x278] sm:$0xff] %v1241_v60  ;;  %v1243_v6 = vadd.f32 0.5, %v987_v61  ;;  %v989_v7 = vmul.f32 0.5, %v1999_v0  ;;  %2026 = vtanh.f32 %v491_v52  ;;  %v506_v63 = vmul.f32 0.5, %v250_v49  ;;  %v253_v0 = vld [vmem:[%s2557_s30 + $0x398] sm:$0xff] }
  0x9a   : > { %v2003_v10 = vpop.eup %2002  ;;  %1498 = vst [vmem:[%s2590_s17 + $0x280] sm:$0xff] %v1242_v1  ;;  %v1244_v11 = vadd.f32 0.5, %v988_v2  ;;  %v990_v12 = vmul.f32 0.5, %v2001_v5  ;;  %2028 = vtanh.f32 %v492_v57  ;;  %v507_v4 = vmul.f32 0.5, %v251_v54  ;;  %v254_v5 = vld [vmem:[%s2557_s30 + $0x3a0] sm:$0xff] }
  0x9b   : > { %v2005_v15 = vpop.eup %2004  ;;  %1499 = vst [vmem:[%s2590_s17 + $0x288] sm:$0xff] %v1243_v6  ;;  %v1245_v16 = vadd.f32 0.5, %v989_v7  ;;  %v991_v17 = vmul.f32 0.5, %v2003_v10  ;;  %2030 = vtanh.f32 %v493_v62  ;;  %v508_v9 = vmul.f32 0.5, %v252_v59  ;;  %v255_v10 = vld [vmem:[%s2557_s30 + $0x3a8] sm:$0xff] }
  0x9c   : > { %v2007_v20 = vpop.eup %2006  ;;  %1500 = vst [vmem:[%s2590_s17 + $0x290] sm:$0xff] %v1244_v11  ;;  %v1246_v21 = vadd.f32 0.5, %v990_v12  ;;  %v992_v22 = vmul.f32 0.5, %v2005_v15  ;;  %2032 = vtanh.f32 %v494_v3  ;;  %v509_v14 = vmul.f32 0.5, %v253_v0  ;;  %v256_v15 = vld [vmem:[%s2557_s30 + $0x3b0] sm:$0xff] }
  0x9d   : > { %v2009_v25 = vpop.eup %2008  ;;  %1501 = vst [vmem:[%s2590_s17 + $0x298] sm:$0xff] %v1245_v16  ;;  %v1247_v26 = vadd.f32 0.5, %v991_v17  ;;  %v993_v27 = vmul.f32 0.5, %v2007_v20  ;;  %2034 = vtanh.f32 %v495_v8  ;;  %v510_v19 = vmul.f32 0.5, %v254_v5  ;;  %v257_v20 = vld [vmem:[%s2557_s30 + $0x3b8] sm:$0xff] }
  0x9e   : > { %v2011_v30 = vpop.eup %2010  ;;  %1502 = vst [vmem:[%s2590_s17 + $0x2a0] sm:$0xff] %v1246_v21  ;;  %v1248_v31 = vadd.f32 0.5, %v992_v22  ;;  %v994_v32 = vmul.f32 0.5, %v2009_v25  ;;  %2036 = vtanh.f32 %v496_v13  ;;  %v511_v24 = vmul.f32 0.5, %v255_v10  ;;  %v258_v25 = vld [vmem:[%s2557_s30 + $0x3c0] sm:$0xff] }
  0x9f   : > { %v2013_v35 = vpop.eup %2012  ;;  %1503 = vst [vmem:[%s2590_s17 + $0x2a8] sm:$0xff] %v1247_v26  ;;  %v1249_v36 = vadd.f32 0.5, %v993_v27  ;;  %v995_v37 = vmul.f32 0.5, %v2011_v30  ;;  %2038 = vtanh.f32 %v497_v18  ;;  %v512_v29 = vmul.f32 0.5, %v256_v15  ;;  %v259_v30 = vld [vmem:[%s2557_s30 + $0x3c8] sm:$0xff] }
  0xa0   : > { %v2015_v40 = vpop.eup %2014  ;;  %1504 = vst [vmem:[%s2590_s17 + $0x2b0] sm:$0xff] %v1248_v31  ;;  %v1250_v41 = vadd.f32 0.5, %v994_v32  ;;  %v996_v42 = vmul.f32 0.5, %v2013_v35  ;;  %2040 = vtanh.f32 %v498_v23  ;;  %v513_v34 = vmul.f32 0.5, %v257_v20  ;;  %v260_v35 = vld [vmem:[%s2557_s30 + $0x3d0] sm:$0xff] }
  0xa1   : > { %v2017_v45 = vpop.eup %2016  ;;  %1505 = vst [vmem:[%s2590_s17 + $0x2b8] sm:$0xff] %v1249_v36  ;;  %v1251_v46 = vadd.f32 0.5, %v995_v37  ;;  %v997_v47 = vmul.f32 0.5, %v2015_v40  ;;  %2042 = vtanh.f32 %v499_v28  ;;  %v514_v39 = vmul.f32 0.5, %v258_v25  ;;  %v261_v40 = vld [vmem:[%s2557_s30 + $0x3d8] sm:$0xff] }
  0xa2   : > { %v2019_v50 = vpop.eup %2018  ;;  %1506 = vst [vmem:[%s2590_s17 + $0x2c0] sm:$0xff] %v1250_v41  ;;  %v1252_v51 = vadd.f32 0.5, %v996_v42  ;;  %v998_v52 = vmul.f32 0.5, %v2017_v45  ;;  %2044 = vtanh.f32 %v500_v33  ;;  %v515_v44 = vmul.f32 0.5, %v259_v30  ;;  %v262_v45 = vld [vmem:[%s2557_s30 + $0x3e0] sm:$0xff] }
  0xa3   : > { %v2021_v55 = vpop.eup %2020  ;;  %1507 = vst [vmem:[%s2590_s17 + $0x2c8] sm:$0xff] %v1251_v46  ;;  %v1253_v56 = vadd.f32 0.5, %v997_v47  ;;  %v999_v57 = vmul.f32 0.5, %v2019_v50  ;;  %2046 = vtanh.f32 %v501_v38  ;;  %v516_v49 = vmul.f32 0.5, %v260_v35  ;;  %v263_v50 = vld [vmem:[%s2557_s30 + $0x3e8] sm:$0xff] }
  0xa4   : > { %v2023_v60 = vpop.eup %2022  ;;  %1508 = vst [vmem:[%s2590_s17 + $0x2d0] sm:$0xff] %v1252_v51  ;;  %v1254_v61 = vadd.f32 0.5, %v998_v52  ;;  %v1000_v62 = vmul.f32 0.5, %v2021_v55  ;;  %2048 = vtanh.f32 %v502_v43  ;;  %v517_v54 = vmul.f32 0.5, %v261_v40  ;;  %v264_v55 = vld [vmem:[%s2557_s30 + $0x3f0] sm:$0xff] }
  0xa5   : > { %v2025_v1 = vpop.eup %2024  ;;  %1509 = vst [vmem:[%s2590_s17 + $0x2d8] sm:$0xff] %v1253_v56  ;;  %v1255_v2 = vadd.f32 0.5, %v999_v57  ;;  %v1001_v3 = vmul.f32 0.5, %v2023_v60  ;;  %2050 = vtanh.f32 %v503_v48  ;;  %v518_v59 = vmul.f32 0.5, %v262_v45  ;;  %v265_v60 = vld [vmem:[%s2557_s30 + $0x3f8] sm:$0xff] }
  0xa6   : > { %v2027_v6 = vpop.eup %2026  ;;  %1510 = vst [vmem:[%s2590_s17 + $0x2e0] sm:$0xff] %v1254_v61  ;;  %v1256_v7 = vadd.f32 0.5, %v1000_v62  ;;  %v1002_v8 = vmul.f32 0.5, %v2025_v1  ;;  %2052 = vtanh.f32 %v504_v53  ;;  %v519_v0 = vmul.f32 0.5, %v263_v50  ;;  %v266_v1 = vld [vmem:[%s2557_s30 + $0x400] sm:$0xff] }
  0xa7   : > { %v2029_v11 = vpop.eup %2028  ;;  %1511 = vst [vmem:[%s2590_s17 + $0x2e8] sm:$0xff] %v1255_v2  ;;  %v1257_v12 = vadd.f32 0.5, %v1001_v3  ;;  %v1003_v13 = vmul.f32 0.5, %v2027_v6  ;;  %2054 = vtanh.f32 %v505_v58  ;;  %v520_v5 = vmul.f32 0.5, %v264_v55  ;;  %v267_v6 = vld [vmem:[%s2557_s30 + $0x408] sm:$0xff] }
  0xa8   : > { %v2031_v16 = vpop.eup %2030  ;;  %1512 = vst [vmem:[%s2590_s17 + $0x2f0] sm:$0xff] %v1256_v7  ;;  %v1258_v17 = vadd.f32 0.5, %v1002_v8  ;;  %v1004_v18 = vmul.f32 0.5, %v2029_v11  ;;  %2056 = vtanh.f32 %v506_v63  ;;  %v521_v10 = vmul.f32 0.5, %v265_v60  ;;  %v268_v11 = vld [vmem:[%s2557_s30 + $0x410] sm:$0xff] }
  0xa9   : > { %v2033_v21 = vpop.eup %2032  ;;  %1513 = vst [vmem:[%s2590_s17 + $0x2f8] sm:$0xff] %v1257_v12  ;;  %v1259_v22 = vadd.f32 0.5, %v1003_v13  ;;  %v1005_v23 = vmul.f32 0.5, %v2031_v16  ;;  %2058 = vtanh.f32 %v507_v4  ;;  %v522_v15 = vmul.f32 0.5, %v266_v1  ;;  %v269_v16 = vld [vmem:[%s2557_s30 + $0x418] sm:$0xff] }
  0xaa   : > { %v2035_v26 = vpop.eup %2034  ;;  %1514 = vst [vmem:[%s2590_s17 + $0x300] sm:$0xff] %v1258_v17  ;;  %v1260_v27 = vadd.f32 0.5, %v1004_v18  ;;  %v1006_v28 = vmul.f32 0.5, %v2033_v21  ;;  %2060 = vtanh.f32 %v508_v9  ;;  %v523_v20 = vmul.f32 0.5, %v267_v6  ;;  %v270_v21 = vld [vmem:[%s2557_s30 + $0x420] sm:$0xff] }
  0xab   : > { %v2037_v31 = vpop.eup %2036  ;;  %1515 = vst [vmem:[%s2590_s17 + $0x308] sm:$0xff] %v1259_v22  ;;  %v1261_v32 = vadd.f32 0.5, %v1005_v23  ;;  %v1007_v33 = vmul.f32 0.5, %v2035_v26  ;;  %2062 = vtanh.f32 %v509_v14  ;;  %v524_v25 = vmul.f32 0.5, %v268_v11  ;;  %v271_v26 = vld [vmem:[%s2557_s30 + $0x428] sm:$0xff] }
  0xac   : > { %v2039_v36 = vpop.eup %2038  ;;  %1516 = vst [vmem:[%s2590_s17 + $0x310] sm:$0xff] %v1260_v27  ;;  %v1262_v37 = vadd.f32 0.5, %v1006_v28  ;;  %v1008_v38 = vmul.f32 0.5, %v2037_v31  ;;  %2064 = vtanh.f32 %v510_v19  ;;  %v525_v30 = vmul.f32 0.5, %v269_v16  ;;  %v272_v31 = vld [vmem:[%s2557_s30 + $0x430] sm:$0xff] }
  0xad   : > { %v2041_v41 = vpop.eup %2040  ;;  %1517 = vst [vmem:[%s2590_s17 + $0x318] sm:$0xff] %v1261_v32  ;;  %v1263_v42 = vadd.f32 0.5, %v1007_v33  ;;  %v1009_v43 = vmul.f32 0.5, %v2039_v36  ;;  %2066 = vtanh.f32 %v511_v24  ;;  %v526_v35 = vmul.f32 0.5, %v270_v21  ;;  %v273_v36 = vld [vmem:[%s2557_s30 + $0x438] sm:$0xff] }
  0xae   : > { %v2043_v46 = vpop.eup %2042  ;;  %1518 = vst [vmem:[%s2590_s17 + $0x320] sm:$0xff] %v1262_v37  ;;  %v1264_v47 = vadd.f32 0.5, %v1008_v38  ;;  %v1010_v48 = vmul.f32 0.5, %v2041_v41  ;;  %2068 = vtanh.f32 %v512_v29  ;;  %v527_v40 = vmul.f32 0.5, %v271_v26  ;;  %v274_v41 = vld [vmem:[%s2557_s30 + $0x440] sm:$0xff] }
  0xaf   : > { %v2045_v51 = vpop.eup %2044  ;;  %1519 = vst [vmem:[%s2590_s17 + $0x328] sm:$0xff] %v1263_v42  ;;  %v1265_v52 = vadd.f32 0.5, %v1009_v43  ;;  %v1011_v53 = vmul.f32 0.5, %v2043_v46  ;;  %2070 = vtanh.f32 %v513_v34  ;;  %v528_v45 = vmul.f32 0.5, %v272_v31  ;;  %v275_v46 = vld [vmem:[%s2557_s30 + $0x448] sm:$0xff] }
  0xb0   : > { %v2047_v56 = vpop.eup %2046  ;;  %1520 = vst [vmem:[%s2590_s17 + $0x330] sm:$0xff] %v1264_v47  ;;  %v1266_v57 = vadd.f32 0.5, %v1010_v48  ;;  %v1012_v58 = vmul.f32 0.5, %v2045_v51  ;;  %2072 = vtanh.f32 %v514_v39  ;;  %v529_v50 = vmul.f32 0.5, %v273_v36  ;;  %v276_v51 = vld [vmem:[%s2557_s30 + $0x450] sm:$0xff] }
  0xb1   : > { %v2049_v61 = vpop.eup %2048  ;;  %1521 = vst [vmem:[%s2590_s17 + $0x338] sm:$0xff] %v1265_v52  ;;  %v1267_v62 = vadd.f32 0.5, %v1011_v53  ;;  %v1013_v63 = vmul.f32 0.5, %v2047_v56  ;;  %2074 = vtanh.f32 %v515_v44  ;;  %v530_v55 = vmul.f32 0.5, %v274_v41  ;;  %v277_v56 = vld [vmem:[%s2557_s30 + $0x458] sm:$0xff] }
  0xb2   : > { %v2051_v2 = vpop.eup %2050  ;;  %1522 = vst [vmem:[%s2590_s17 + $0x340] sm:$0xff] %v1266_v57  ;;  %v1268_v3 = vadd.f32 0.5, %v1012_v58  ;;  %v1014_v4 = vmul.f32 0.5, %v2049_v61  ;;  %2076 = vtanh.f32 %v516_v49  ;;  %v531_v60 = vmul.f32 0.5, %v275_v46  ;;  %v278_v61 = vld [vmem:[%s2557_s30 + $0x460] sm:$0xff] }
  0xb3   : > { %v2053_v7 = vpop.eup %2052  ;;  %1523 = vst [vmem:[%s2590_s17 + $0x348] sm:$0xff] %v1267_v62  ;;  %v1269_v8 = vadd.f32 0.5, %v1013_v63  ;;  %v1015_v9 = vmul.f32 0.5, %v2051_v2  ;;  %2078 = vtanh.f32 %v517_v54  ;;  %v532_v1 = vmul.f32 0.5, %v276_v51  ;;  %v279_v2 = vld [vmem:[%s2557_s30 + $0x468] sm:$0xff] }
  0xb4   : > { %v2055_v12 = vpop.eup %2054  ;;  %1524 = vst [vmem:[%s2590_s17 + $0x350] sm:$0xff] %v1268_v3  ;;  %v1270_v13 = vadd.f32 0.5, %v1014_v4  ;;  %v1016_v14 = vmul.f32 0.5, %v2053_v7  ;;  %2080 = vtanh.f32 %v518_v59  ;;  %v533_v6 = vmul.f32 0.5, %v277_v56  ;;  %v280_v7 = vld [vmem:[%s2557_s30 + $0x470] sm:$0xff] }
  0xb5   : > { %v2057_v17 = vpop.eup %2056  ;;  %1525 = vst [vmem:[%s2590_s17 + $0x358] sm:$0xff] %v1269_v8  ;;  %v1271_v18 = vadd.f32 0.5, %v1015_v9  ;;  %v1017_v19 = vmul.f32 0.5, %v2055_v12  ;;  %2082 = vtanh.f32 %v519_v0  ;;  %v534_v11 = vmul.f32 0.5, %v278_v61  ;;  %v281_v12 = vld [vmem:[%s2557_s30 + $0x478] sm:$0xff] }
  0xb6   : > { %v2059_v22 = vpop.eup %2058  ;;  %1526 = vst [vmem:[%s2590_s17 + $0x360] sm:$0xff] %v1270_v13  ;;  %v1272_v23 = vadd.f32 0.5, %v1016_v14  ;;  %v1018_v24 = vmul.f32 0.5, %v2057_v17  ;;  %2084 = vtanh.f32 %v520_v5  ;;  %v535_v16 = vmul.f32 0.5, %v279_v2  ;;  %v282_v17 = vld [vmem:[%s2557_s30 + $0x480] sm:$0xff] }
  0xb7   : > { %v2061_v27 = vpop.eup %2060  ;;  %1527 = vst [vmem:[%s2590_s17 + $0x368] sm:$0xff] %v1271_v18  ;;  %v1273_v28 = vadd.f32 0.5, %v1017_v19  ;;  %v1019_v29 = vmul.f32 0.5, %v2059_v22  ;;  %2086 = vtanh.f32 %v521_v10  ;;  %v536_v21 = vmul.f32 0.5, %v280_v7  ;;  %v283_v22 = vld [vmem:[%s2557_s30 + $0x488] sm:$0xff] }
  0xb8   : > { %v2063_v32 = vpop.eup %2062  ;;  %1528 = vst [vmem:[%s2590_s17 + $0x370] sm:$0xff] %v1272_v23  ;;  %v1274_v33 = vadd.f32 0.5, %v1018_v24  ;;  %v1020_v34 = vmul.f32 0.5, %v2061_v27  ;;  %2088 = vtanh.f32 %v522_v15  ;;  %v537_v26 = vmul.f32 0.5, %v281_v12  ;;  %v284_v27 = vld [vmem:[%s2557_s30 + $0x490] sm:$0xff] }
  0xb9   : > { %v2065_v37 = vpop.eup %2064  ;;  %1529 = vst [vmem:[%s2590_s17 + $0x378] sm:$0xff] %v1273_v28  ;;  %v1275_v38 = vadd.f32 0.5, %v1019_v29  ;;  %v1021_v39 = vmul.f32 0.5, %v2063_v32  ;;  %2090 = vtanh.f32 %v523_v20  ;;  %v538_v31 = vmul.f32 0.5, %v282_v17  ;;  %v285_v32 = vld [vmem:[%s2557_s30 + $0x498] sm:$0xff] }
  0xba   : > { %v2067_v42 = vpop.eup %2066  ;;  %1530 = vst [vmem:[%s2590_s17 + $0x380] sm:$0xff] %v1274_v33  ;;  %v1276_v43 = vadd.f32 0.5, %v1020_v34  ;;  %v1022_v44 = vmul.f32 0.5, %v2065_v37  ;;  %2092 = vtanh.f32 %v524_v25  ;;  %v539_v36 = vmul.f32 0.5, %v283_v22  ;;  %v286_v37 = vld [vmem:[%s2557_s30 + $0x4a0] sm:$0xff] }
  0xbb   : > { %v2069_v47 = vpop.eup %2068  ;;  %1531 = vst [vmem:[%s2590_s17 + $0x388] sm:$0xff] %v1275_v38  ;;  %v1277_v48 = vadd.f32 0.5, %v1021_v39  ;;  %v1023_v49 = vmul.f32 0.5, %v2067_v42  ;;  %2094 = vtanh.f32 %v525_v30  ;;  %v540_v41 = vmul.f32 0.5, %v284_v27  ;;  %v287_v42 = vld [vmem:[%s2557_s30 + $0x4a8] sm:$0xff] }
  0xbc   : > { %v2071_v52 = vpop.eup %2070  ;;  %1532 = vst [vmem:[%s2590_s17 + $0x390] sm:$0xff] %v1276_v43  ;;  %v1278_v53 = vadd.f32 0.5, %v1022_v44  ;;  %v1024_v54 = vmul.f32 0.5, %v2069_v47  ;;  %2096 = vtanh.f32 %v526_v35  ;;  %v541_v46 = vmul.f32 0.5, %v285_v32  ;;  %v288_v47 = vld [vmem:[%s2557_s30 + $0x4b0] sm:$0xff] }
  0xbd   : > { %v2073_v57 = vpop.eup %2072  ;;  %1533 = vst [vmem:[%s2590_s17 + $0x398] sm:$0xff] %v1277_v48  ;;  %v1279_v58 = vadd.f32 0.5, %v1023_v49  ;;  %v1025_v59 = vmul.f32 0.5, %v2071_v52  ;;  %2098 = vtanh.f32 %v527_v40  ;;  %v542_v51 = vmul.f32 0.5, %v286_v37  ;;  %v289_v52 = vld [vmem:[%s2557_s30 + $0x4b8] sm:$0xff] }
  0xbe   : > { %v2075_v62 = vpop.eup %2074  ;;  %1534 = vst [vmem:[%s2590_s17 + $0x3a0] sm:$0xff] %v1278_v53  ;;  %v1280_v63 = vadd.f32 0.5, %v1024_v54  ;;  %v1026_v0 = vmul.f32 0.5, %v2073_v57  ;;  %2100 = vtanh.f32 %v528_v45  ;;  %v543_v56 = vmul.f32 0.5, %v287_v42  ;;  %v290_v57 = vld [vmem:[%s2557_s30 + $0x4c0] sm:$0xff] }
  0xbf   : > { %v2077_v3 = vpop.eup %2076  ;;  %1535 = vst [vmem:[%s2590_s17 + $0x3a8] sm:$0xff] %v1279_v58  ;;  %v1281_v4 = vadd.f32 0.5, %v1025_v59  ;;  %v1027_v5 = vmul.f32 0.5, %v2075_v62  ;;  %2102 = vtanh.f32 %v529_v50  ;;  %v544_v61 = vmul.f32 0.5, %v288_v47  ;;  %v291_v62 = vld [vmem:[%s2557_s30 + $0x4c8] sm:$0xff] }
  0xc0   : > { %v2079_v8 = vpop.eup %2078  ;;  %1536 = vst [vmem:[%s2590_s17 + $0x3b0] sm:$0xff] %v1280_v63  ;;  %v1282_v9 = vadd.f32 0.5, %v1026_v0  ;;  %v1028_v10 = vmul.f32 0.5, %v2077_v3  ;;  %2104 = vtanh.f32 %v530_v55  ;;  %v545_v2 = vmul.f32 0.5, %v289_v52  ;;  %v292_v3 = vld [vmem:[%s2557_s30 + $0x4d0] sm:$0xff] }
  0xc1   : > { %v2081_v13 = vpop.eup %2080  ;;  %1537 = vst [vmem:[%s2590_s17 + $0x3b8] sm:$0xff] %v1281_v4  ;;  %v1283_v14 = vadd.f32 0.5, %v1027_v5  ;;  %v1029_v15 = vmul.f32 0.5, %v2079_v8  ;;  %2106 = vtanh.f32 %v531_v60  ;;  %v546_v7 = vmul.f32 0.5, %v290_v57  ;;  %v293_v8 = vld [vmem:[%s2557_s30 + $0x4d8] sm:$0xff] }
  0xc2   : > { %v2083_v18 = vpop.eup %2082  ;;  %1538 = vst [vmem:[%s2590_s17 + $0x3c0] sm:$0xff] %v1282_v9  ;;  %v1284_v19 = vadd.f32 0.5, %v1028_v10  ;;  %v1030_v20 = vmul.f32 0.5, %v2081_v13  ;;  %2108 = vtanh.f32 %v532_v1  ;;  %v547_v12 = vmul.f32 0.5, %v291_v62  ;;  %v294_v13 = vld [vmem:[%s2557_s30 + $0x4e0] sm:$0xff] }
  0xc3   : > { %v2085_v23 = vpop.eup %2084  ;;  %1539 = vst [vmem:[%s2590_s17 + $0x3c8] sm:$0xff] %v1283_v14  ;;  %v1285_v24 = vadd.f32 0.5, %v1029_v15  ;;  %v1031_v25 = vmul.f32 0.5, %v2083_v18  ;;  %2110 = vtanh.f32 %v533_v6  ;;  %v548_v17 = vmul.f32 0.5, %v292_v3  ;;  %v295_v18 = vld [vmem:[%s2557_s30 + $0x4e8] sm:$0xff] }
  0xc4   : > { %v2087_v28 = vpop.eup %2086  ;;  %1540 = vst [vmem:[%s2590_s17 + $0x3d0] sm:$0xff] %v1284_v19  ;;  %v1286_v29 = vadd.f32 0.5, %v1030_v20  ;;  %v1032_v30 = vmul.f32 0.5, %v2085_v23  ;;  %2112 = vtanh.f32 %v534_v11  ;;  %v549_v22 = vmul.f32 0.5, %v293_v8  ;;  %v296_v23 = vld [vmem:[%s2557_s30 + $0x4f0] sm:$0xff] }
  0xc5   : > { %v2089_v33 = vpop.eup %2088  ;;  %1541 = vst [vmem:[%s2590_s17 + $0x3d8] sm:$0xff] %v1285_v24  ;;  %v1287_v34 = vadd.f32 0.5, %v1031_v25  ;;  %v1033_v35 = vmul.f32 0.5, %v2087_v28  ;;  %2114 = vtanh.f32 %v535_v16  ;;  %v550_v27 = vmul.f32 0.5, %v294_v13  ;;  %v297_v28 = vld [vmem:[%s2557_s30 + $0x4f8] sm:$0xff] }
  0xc6   : > { %v2091_v38 = vpop.eup %2090  ;;  %1542 = vst [vmem:[%s2590_s17 + $0x3e0] sm:$0xff] %v1286_v29  ;;  %v1288_v39 = vadd.f32 0.5, %v1032_v30  ;;  %v1034_v40 = vmul.f32 0.5, %v2089_v33  ;;  %2116 = vtanh.f32 %v536_v21  ;;  %v551_v32 = vmul.f32 0.5, %v295_v18  ;;  %v298_v33 = vld [vmem:[%s2557_s30 + $0x500] sm:$0xff] }
  0xc7   : > { %v2093_v43 = vpop.eup %2092  ;;  %1543 = vst [vmem:[%s2590_s17 + $0x3e8] sm:$0xff] %v1287_v34  ;;  %v1289_v44 = vadd.f32 0.5, %v1033_v35  ;;  %v1035_v45 = vmul.f32 0.5, %v2091_v38  ;;  %2118 = vtanh.f32 %v537_v26  ;;  %v552_v37 = vmul.f32 0.5, %v296_v23  ;;  %v299_v38 = vld [vmem:[%s2557_s30 + $0x508] sm:$0xff] }
  0xc8   : > { %v2095_v48 = vpop.eup %2094  ;;  %1544 = vst [vmem:[%s2590_s17 + $0x3f0] sm:$0xff] %v1288_v39  ;;  %v1290_v49 = vadd.f32 0.5, %v1034_v40  ;;  %v1036_v50 = vmul.f32 0.5, %v2093_v43  ;;  %2120 = vtanh.f32 %v538_v31  ;;  %v553_v42 = vmul.f32 0.5, %v297_v28  ;;  %v300_v43 = vld [vmem:[%s2557_s30 + $0x510] sm:$0xff] }
  0xc9   : > { %v2097_v53 = vpop.eup %2096  ;;  %1545 = vst [vmem:[%s2590_s17 + $0x3f8] sm:$0xff] %v1289_v44  ;;  %v1291_v54 = vadd.f32 0.5, %v1035_v45  ;;  %v1037_v55 = vmul.f32 0.5, %v2095_v48  ;;  %2122 = vtanh.f32 %v539_v36  ;;  %v554_v47 = vmul.f32 0.5, %v298_v33  ;;  %v301_v48 = vld [vmem:[%s2557_s30 + $0x518] sm:$0xff] }
  0xca   : > { %v2099_v58 = vpop.eup %2098  ;;  %1546 = vst [vmem:[%s2590_s17 + $0x400] sm:$0xff] %v1290_v49  ;;  %v1292_v59 = vadd.f32 0.5, %v1036_v50  ;;  %v1038_v60 = vmul.f32 0.5, %v2097_v53  ;;  %2124 = vtanh.f32 %v540_v41  ;;  %v555_v52 = vmul.f32 0.5, %v299_v38  ;;  %v302_v53 = vld [vmem:[%s2557_s30 + $0x520] sm:$0xff] }
  0xcb   : > { %v2101_v63 = vpop.eup %2100  ;;  %1547 = vst [vmem:[%s2590_s17 + $0x408] sm:$0xff] %v1291_v54  ;;  %v1293_v0 = vadd.f32 0.5, %v1037_v55  ;;  %v1039_v1 = vmul.f32 0.5, %v2099_v58  ;;  %2126 = vtanh.f32 %v541_v46  ;;  %v556_v57 = vmul.f32 0.5, %v300_v43  ;;  %v303_v58 = vld [vmem:[%s2557_s30 + $0x528] sm:$0xff] }
  0xcc   : > { %v2103_v4 = vpop.eup %2102  ;;  %1548 = vst [vmem:[%s2590_s17 + $0x410] sm:$0xff] %v1292_v59  ;;  %v1294_v5 = vadd.f32 0.5, %v1038_v60  ;;  %v1040_v6 = vmul.f32 0.5, %v2101_v63  ;;  %2128 = vtanh.f32 %v542_v51  ;;  %v557_v62 = vmul.f32 0.5, %v301_v48  ;;  %v304_v63 = vld [vmem:[%s2557_s30 + $0x530] sm:$0xff] }
  0xcd   : > { %v2105_v9 = vpop.eup %2104  ;;  %1549 = vst [vmem:[%s2590_s17 + $0x418] sm:$0xff] %v1293_v0  ;;  %v1295_v10 = vadd.f32 0.5, %v1039_v1  ;;  %v1041_v11 = vmul.f32 0.5, %v2103_v4  ;;  %2130 = vtanh.f32 %v543_v56  ;;  %v558_v3 = vmul.f32 0.5, %v302_v53  ;;  %v305_v4 = vld [vmem:[%s2557_s30 + $0x538] sm:$0xff] }
  0xce   : > { %v2107_v14 = vpop.eup %2106  ;;  %1550 = vst [vmem:[%s2590_s17 + $0x420] sm:$0xff] %v1294_v5  ;;  %v1296_v15 = vadd.f32 0.5, %v1040_v6  ;;  %v1042_v16 = vmul.f32 0.5, %v2105_v9  ;;  %2132 = vtanh.f32 %v544_v61  ;;  %v559_v8 = vmul.f32 0.5, %v303_v58  ;;  %v306_v9 = vld [vmem:[%s2557_s30 + $0x540] sm:$0xff] }
  0xcf   : > { %v2109_v19 = vpop.eup %2108  ;;  %1551 = vst [vmem:[%s2590_s17 + $0x428] sm:$0xff] %v1295_v10  ;;  %v1297_v20 = vadd.f32 0.5, %v1041_v11  ;;  %v1043_v21 = vmul.f32 0.5, %v2107_v14  ;;  %2134 = vtanh.f32 %v545_v2  ;;  %v560_v13 = vmul.f32 0.5, %v304_v63  ;;  %v307_v14 = vld [vmem:[%s2557_s30 + $0x548] sm:$0xff] }
  0xd0   : > { %v2111_v24 = vpop.eup %2110  ;;  %1552 = vst [vmem:[%s2590_s17 + $0x430] sm:$0xff] %v1296_v15  ;;  %v1298_v25 = vadd.f32 0.5, %v1042_v16  ;;  %v1044_v26 = vmul.f32 0.5, %v2109_v19  ;;  %2136 = vtanh.f32 %v546_v7  ;;  %v561_v18 = vmul.f32 0.5, %v305_v4  ;;  %v308_v19 = vld [vmem:[%s2557_s30 + $0x550] sm:$0xff] }
  0xd1   : > { %v2113_v29 = vpop.eup %2112  ;;  %1553 = vst [vmem:[%s2590_s17 + $0x438] sm:$0xff] %v1297_v20  ;;  %v1299_v30 = vadd.f32 0.5, %v1043_v21  ;;  %v1045_v31 = vmul.f32 0.5, %v2111_v24  ;;  %2138 = vtanh.f32 %v547_v12  ;;  %v562_v23 = vmul.f32 0.5, %v306_v9  ;;  %v309_v24 = vld [vmem:[%s2557_s30 + $0x558] sm:$0xff] }
  0xd2   : > { %v2115_v34 = vpop.eup %2114  ;;  %1554 = vst [vmem:[%s2590_s17 + $0x440] sm:$0xff] %v1298_v25  ;;  %v1300_v35 = vadd.f32 0.5, %v1044_v26  ;;  %v1046_v36 = vmul.f32 0.5, %v2113_v29  ;;  %2140 = vtanh.f32 %v548_v17  ;;  %v563_v28 = vmul.f32 0.5, %v307_v14  ;;  %v310_v29 = vld [vmem:[%s2557_s30 + $0x560] sm:$0xff] }
  0xd3   : > { %v2117_v39 = vpop.eup %2116  ;;  %1555 = vst [vmem:[%s2590_s17 + $0x448] sm:$0xff] %v1299_v30  ;;  %v1301_v40 = vadd.f32 0.5, %v1045_v31  ;;  %v1047_v41 = vmul.f32 0.5, %v2115_v34  ;;  %2142 = vtanh.f32 %v549_v22  ;;  %v564_v33 = vmul.f32 0.5, %v308_v19  ;;  %v311_v34 = vld [vmem:[%s2557_s30 + $0x568] sm:$0xff] }
  0xd4   : > { %v2119_v44 = vpop.eup %2118  ;;  %1556 = vst [vmem:[%s2590_s17 + $0x450] sm:$0xff] %v1300_v35  ;;  %v1302_v45 = vadd.f32 0.5, %v1046_v36  ;;  %v1048_v46 = vmul.f32 0.5, %v2117_v39  ;;  %2144 = vtanh.f32 %v550_v27  ;;  %v565_v38 = vmul.f32 0.5, %v309_v24  ;;  %v312_v39 = vld [vmem:[%s2557_s30 + $0x570] sm:$0xff] }
  0xd5   : > { %v2121_v49 = vpop.eup %2120  ;;  %1557 = vst [vmem:[%s2590_s17 + $0x458] sm:$0xff] %v1301_v40  ;;  %v1303_v50 = vadd.f32 0.5, %v1047_v41  ;;  %v1049_v51 = vmul.f32 0.5, %v2119_v44  ;;  %2146 = vtanh.f32 %v551_v32  ;;  %v566_v43 = vmul.f32 0.5, %v310_v29  ;;  %v313_v44 = vld [vmem:[%s2557_s30 + $0x578] sm:$0xff] }
  0xd6   : > { %v2123_v54 = vpop.eup %2122  ;;  %1558 = vst [vmem:[%s2590_s17 + $0x460] sm:$0xff] %v1302_v45  ;;  %v1304_v55 = vadd.f32 0.5, %v1048_v46  ;;  %v1050_v56 = vmul.f32 0.5, %v2121_v49  ;;  %2148 = vtanh.f32 %v552_v37  ;;  %v567_v48 = vmul.f32 0.5, %v311_v34  ;;  %v314_v49 = vld [vmem:[%s2557_s30 + $0x580] sm:$0xff] }
  0xd7   : > { %v2125_v59 = vpop.eup %2124  ;;  %1559 = vst [vmem:[%s2590_s17 + $0x468] sm:$0xff] %v1303_v50  ;;  %v1305_v60 = vadd.f32 0.5, %v1049_v51  ;;  %v1051_v61 = vmul.f32 0.5, %v2123_v54  ;;  %2150 = vtanh.f32 %v553_v42  ;;  %v568_v53 = vmul.f32 0.5, %v312_v39  ;;  %v315_v54 = vld [vmem:[%s2557_s30 + $0x588] sm:$0xff] }
  0xd8   : > { %v2127_v0 = vpop.eup %2126  ;;  %1560 = vst [vmem:[%s2590_s17 + $0x470] sm:$0xff] %v1304_v55  ;;  %v1306_v1 = vadd.f32 0.5, %v1050_v56  ;;  %v1052_v2 = vmul.f32 0.5, %v2125_v59  ;;  %2152 = vtanh.f32 %v554_v47  ;;  %v569_v58 = vmul.f32 0.5, %v313_v44  ;;  %v316_v59 = vld [vmem:[%s2557_s30 + $0x590] sm:$0xff] }
  0xd9   : > { %v2129_v5 = vpop.eup %2128  ;;  %1561 = vst [vmem:[%s2590_s17 + $0x478] sm:$0xff] %v1305_v60  ;;  %v1307_v6 = vadd.f32 0.5, %v1051_v61  ;;  %v1053_v7 = vmul.f32 0.5, %v2127_v0  ;;  %2154 = vtanh.f32 %v555_v52  ;;  %v570_v63 = vmul.f32 0.5, %v314_v49  ;;  %v317_v0 = vld [vmem:[%s2557_s30 + $0x598] sm:$0xff] }
  0xda   : > { %v2131_v10 = vpop.eup %2130  ;;  %1562 = vst [vmem:[%s2590_s17 + $0x480] sm:$0xff] %v1306_v1  ;;  %v1308_v11 = vadd.f32 0.5, %v1052_v2  ;;  %v1054_v12 = vmul.f32 0.5, %v2129_v5  ;;  %2156 = vtanh.f32 %v556_v57  ;;  %v571_v4 = vmul.f32 0.5, %v315_v54  ;;  %v318_v5 = vld [vmem:[%s2557_s30 + $0x5a0] sm:$0xff] }
  0xdb   : > { %v2133_v15 = vpop.eup %2132  ;;  %1563 = vst [vmem:[%s2590_s17 + $0x488] sm:$0xff] %v1307_v6  ;;  %v1309_v16 = vadd.f32 0.5, %v1053_v7  ;;  %v1055_v17 = vmul.f32 0.5, %v2131_v10  ;;  %2158 = vtanh.f32 %v557_v62  ;;  %v572_v9 = vmul.f32 0.5, %v316_v59  ;;  %v319_v10 = vld [vmem:[%s2557_s30 + $0x5a8] sm:$0xff] }
  0xdc   : > { %v2135_v20 = vpop.eup %2134  ;;  %1564 = vst [vmem:[%s2590_s17 + $0x490] sm:$0xff] %v1308_v11  ;;  %v1310_v21 = vadd.f32 0.5, %v1054_v12  ;;  %v1056_v22 = vmul.f32 0.5, %v2133_v15  ;;  %2160 = vtanh.f32 %v558_v3  ;;  %v573_v14 = vmul.f32 0.5, %v317_v0  ;;  %v320_v15 = vld [vmem:[%s2557_s30 + $0x5b0] sm:$0xff] }
  0xdd   : > { %v2137_v25 = vpop.eup %2136  ;;  %1565 = vst [vmem:[%s2590_s17 + $0x498] sm:$0xff] %v1309_v16  ;;  %v1311_v26 = vadd.f32 0.5, %v1055_v17  ;;  %v1057_v27 = vmul.f32 0.5, %v2135_v20  ;;  %2162 = vtanh.f32 %v559_v8  ;;  %v574_v19 = vmul.f32 0.5, %v318_v5  ;;  %v321_v20 = vld [vmem:[%s2557_s30 + $0x5b8] sm:$0xff] }
  0xde   : > { %v2139_v30 = vpop.eup %2138  ;;  %1566 = vst [vmem:[%s2590_s17 + $0x4a0] sm:$0xff] %v1310_v21  ;;  %v1312_v31 = vadd.f32 0.5, %v1056_v22  ;;  %v1058_v32 = vmul.f32 0.5, %v2137_v25  ;;  %2164 = vtanh.f32 %v560_v13  ;;  %v575_v24 = vmul.f32 0.5, %v319_v10  ;;  %v322_v25 = vld [vmem:[%s2557_s30 + $0x5c0] sm:$0xff] }
  0xdf   : > { %v2141_v35 = vpop.eup %2140  ;;  %1567 = vst [vmem:[%s2590_s17 + $0x4a8] sm:$0xff] %v1311_v26  ;;  %v1313_v36 = vadd.f32 0.5, %v1057_v27  ;;  %v1059_v37 = vmul.f32 0.5, %v2139_v30  ;;  %2166 = vtanh.f32 %v561_v18  ;;  %v576_v29 = vmul.f32 0.5, %v320_v15  ;;  %v323_v30 = vld [vmem:[%s2557_s30 + $0x5c8] sm:$0xff] }
  0xe0   : > { %v2143_v40 = vpop.eup %2142  ;;  %1568 = vst [vmem:[%s2590_s17 + $0x4b0] sm:$0xff] %v1312_v31  ;;  %v1314_v41 = vadd.f32 0.5, %v1058_v32  ;;  %v1060_v42 = vmul.f32 0.5, %v2141_v35  ;;  %2168 = vtanh.f32 %v562_v23  ;;  %v577_v34 = vmul.f32 0.5, %v321_v20  ;;  %v324_v35 = vld [vmem:[%s2557_s30 + $0x5d0] sm:$0xff] }
  0xe1   : > { %v2145_v45 = vpop.eup %2144  ;;  %1569 = vst [vmem:[%s2590_s17 + $0x4b8] sm:$0xff] %v1313_v36  ;;  %v1315_v46 = vadd.f32 0.5, %v1059_v37  ;;  %v1061_v47 = vmul.f32 0.5, %v2143_v40  ;;  %2170 = vtanh.f32 %v563_v28  ;;  %v578_v39 = vmul.f32 0.5, %v322_v25  ;;  %v325_v40 = vld [vmem:[%s2557_s30 + $0x5d8] sm:$0xff] }
  0xe2   : > { %v2147_v50 = vpop.eup %2146  ;;  %1570 = vst [vmem:[%s2590_s17 + $0x4c0] sm:$0xff] %v1314_v41  ;;  %v1316_v51 = vadd.f32 0.5, %v1060_v42  ;;  %v1062_v52 = vmul.f32 0.5, %v2145_v45  ;;  %2172 = vtanh.f32 %v564_v33  ;;  %v579_v44 = vmul.f32 0.5, %v323_v30  ;;  %v326_v45 = vld [vmem:[%s2557_s30 + $0x5e0] sm:$0xff] }
  0xe3   : > { %v2149_v55 = vpop.eup %2148  ;;  %1571 = vst [vmem:[%s2590_s17 + $0x4c8] sm:$0xff] %v1315_v46  ;;  %v1317_v56 = vadd.f32 0.5, %v1061_v47  ;;  %v1063_v57 = vmul.f32 0.5, %v2147_v50  ;;  %2174 = vtanh.f32 %v565_v38  ;;  %v580_v49 = vmul.f32 0.5, %v324_v35  ;;  %v327_v50 = vld [vmem:[%s2557_s30 + $0x5e8] sm:$0xff] }
  0xe4   : > { %v2151_v60 = vpop.eup %2150  ;;  %1572 = vst [vmem:[%s2590_s17 + $0x4d0] sm:$0xff] %v1316_v51  ;;  %v1318_v61 = vadd.f32 0.5, %v1062_v52  ;;  %v1064_v62 = vmul.f32 0.5, %v2149_v55  ;;  %2176 = vtanh.f32 %v566_v43  ;;  %v581_v54 = vmul.f32 0.5, %v325_v40  ;;  %v328_v55 = vld [vmem:[%s2557_s30 + $0x5f0] sm:$0xff] }
  0xe5   : > { %v2153_v1 = vpop.eup %2152  ;;  %1573 = vst [vmem:[%s2590_s17 + $0x4d8] sm:$0xff] %v1317_v56  ;;  %v1319_v2 = vadd.f32 0.5, %v1063_v57  ;;  %v1065_v3 = vmul.f32 0.5, %v2151_v60  ;;  %2178 = vtanh.f32 %v567_v48  ;;  %v582_v59 = vmul.f32 0.5, %v326_v45  ;;  %v329_v60 = vld [vmem:[%s2557_s30 + $0x5f8] sm:$0xff] }
  0xe6   : > { %v2155_v6 = vpop.eup %2154  ;;  %1574 = vst [vmem:[%s2590_s17 + $0x4e0] sm:$0xff] %v1318_v61  ;;  %v1320_v7 = vadd.f32 0.5, %v1064_v62  ;;  %v1066_v8 = vmul.f32 0.5, %v2153_v1  ;;  %2180 = vtanh.f32 %v568_v53  ;;  %v583_v0 = vmul.f32 0.5, %v327_v50  ;;  %v330_v1 = vld [vmem:[%s2557_s30 + $0x600] sm:$0xff] }
  0xe7   : > { %v2157_v11 = vpop.eup %2156  ;;  %1575 = vst [vmem:[%s2590_s17 + $0x4e8] sm:$0xff] %v1319_v2  ;;  %v1321_v12 = vadd.f32 0.5, %v1065_v3  ;;  %v1067_v13 = vmul.f32 0.5, %v2155_v6  ;;  %2182 = vtanh.f32 %v569_v58  ;;  %v584_v5 = vmul.f32 0.5, %v328_v55  ;;  %v331_v6 = vld [vmem:[%s2557_s30 + $0x608] sm:$0xff] }
  0xe8   : > { %v2159_v16 = vpop.eup %2158  ;;  %1576 = vst [vmem:[%s2590_s17 + $0x4f0] sm:$0xff] %v1320_v7  ;;  %v1322_v17 = vadd.f32 0.5, %v1066_v8  ;;  %v1068_v18 = vmul.f32 0.5, %v2157_v11  ;;  %2184 = vtanh.f32 %v570_v63  ;;  %v585_v10 = vmul.f32 0.5, %v329_v60  ;;  %v332_v11 = vld [vmem:[%s2557_s30 + $0x610] sm:$0xff] }
  0xe9   : > { %v2161_v21 = vpop.eup %2160  ;;  %1577 = vst [vmem:[%s2590_s17 + $0x4f8] sm:$0xff] %v1321_v12  ;;  %v1323_v22 = vadd.f32 0.5, %v1067_v13  ;;  %v1069_v23 = vmul.f32 0.5, %v2159_v16  ;;  %2186 = vtanh.f32 %v571_v4  ;;  %v586_v15 = vmul.f32 0.5, %v330_v1  ;;  %v333_v16 = vld [vmem:[%s2557_s30 + $0x618] sm:$0xff] }
  0xea   : > { %v2163_v26 = vpop.eup %2162  ;;  %1578 = vst [vmem:[%s2590_s17 + $0x500] sm:$0xff] %v1322_v17  ;;  %v1324_v27 = vadd.f32 0.5, %v1068_v18  ;;  %v1070_v28 = vmul.f32 0.5, %v2161_v21  ;;  %2188 = vtanh.f32 %v572_v9  ;;  %v587_v20 = vmul.f32 0.5, %v331_v6  ;;  %v334_v21 = vld [vmem:[%s2557_s30 + $0x620] sm:$0xff] }
  0xeb   : > { %v2165_v31 = vpop.eup %2164  ;;  %1579 = vst [vmem:[%s2590_s17 + $0x508] sm:$0xff] %v1323_v22  ;;  %v1325_v32 = vadd.f32 0.5, %v1069_v23  ;;  %v1071_v33 = vmul.f32 0.5, %v2163_v26  ;;  %2190 = vtanh.f32 %v573_v14  ;;  %v588_v25 = vmul.f32 0.5, %v332_v11  ;;  %v335_v26 = vld [vmem:[%s2557_s30 + $0x628] sm:$0xff] }
  0xec   : > { %v2167_v36 = vpop.eup %2166  ;;  %1580 = vst [vmem:[%s2590_s17 + $0x510] sm:$0xff] %v1324_v27  ;;  %v1326_v37 = vadd.f32 0.5, %v1070_v28  ;;  %v1072_v38 = vmul.f32 0.5, %v2165_v31  ;;  %2192 = vtanh.f32 %v574_v19  ;;  %v589_v30 = vmul.f32 0.5, %v333_v16  ;;  %v336_v31 = vld [vmem:[%s2557_s30 + $0x630] sm:$0xff] }
  0xed   : > { %v2169_v41 = vpop.eup %2168  ;;  %1581 = vst [vmem:[%s2590_s17 + $0x518] sm:$0xff] %v1325_v32  ;;  %v1327_v42 = vadd.f32 0.5, %v1071_v33  ;;  %v1073_v43 = vmul.f32 0.5, %v2167_v36  ;;  %2194 = vtanh.f32 %v575_v24  ;;  %v590_v35 = vmul.f32 0.5, %v334_v21  ;;  %v337_v36 = vld [vmem:[%s2557_s30 + $0x638] sm:$0xff] }
  0xee   : > { %v2171_v46 = vpop.eup %2170  ;;  %1582 = vst [vmem:[%s2590_s17 + $0x520] sm:$0xff] %v1326_v37  ;;  %v1328_v47 = vadd.f32 0.5, %v1072_v38  ;;  %v1074_v48 = vmul.f32 0.5, %v2169_v41  ;;  %2196 = vtanh.f32 %v576_v29  ;;  %v591_v40 = vmul.f32 0.5, %v335_v26  ;;  %v338_v41 = vld [vmem:[%s2557_s30 + $0x640] sm:$0xff] }
  0xef   : > { %v2173_v51 = vpop.eup %2172  ;;  %1583 = vst [vmem:[%s2590_s17 + $0x528] sm:$0xff] %v1327_v42  ;;  %v1329_v52 = vadd.f32 0.5, %v1073_v43  ;;  %v1075_v53 = vmul.f32 0.5, %v2171_v46  ;;  %2198 = vtanh.f32 %v577_v34  ;;  %v592_v45 = vmul.f32 0.5, %v336_v31  ;;  %v339_v46 = vld [vmem:[%s2557_s30 + $0x648] sm:$0xff] }
  0xf0   : > { %v2175_v56 = vpop.eup %2174  ;;  %1584 = vst [vmem:[%s2590_s17 + $0x530] sm:$0xff] %v1328_v47  ;;  %v1330_v57 = vadd.f32 0.5, %v1074_v48  ;;  %v1076_v58 = vmul.f32 0.5, %v2173_v51  ;;  %2200 = vtanh.f32 %v578_v39  ;;  %v593_v50 = vmul.f32 0.5, %v337_v36  ;;  %v340_v51 = vld [vmem:[%s2557_s30 + $0x650] sm:$0xff] }
  0xf1   : > { %v2177_v61 = vpop.eup %2176  ;;  %1585 = vst [vmem:[%s2590_s17 + $0x538] sm:$0xff] %v1329_v52  ;;  %v1331_v62 = vadd.f32 0.5, %v1075_v53  ;;  %v1077_v63 = vmul.f32 0.5, %v2175_v56  ;;  %2202 = vtanh.f32 %v579_v44  ;;  %v594_v55 = vmul.f32 0.5, %v338_v41  ;;  %v341_v56 = vld [vmem:[%s2557_s30 + $0x658] sm:$0xff] }
  0xf2   : > { %v2179_v2 = vpop.eup %2178  ;;  %1586 = vst [vmem:[%s2590_s17 + $0x540] sm:$0xff] %v1330_v57  ;;  %v1332_v3 = vadd.f32 0.5, %v1076_v58  ;;  %v1078_v4 = vmul.f32 0.5, %v2177_v61  ;;  %2204 = vtanh.f32 %v580_v49  ;;  %v595_v60 = vmul.f32 0.5, %v339_v46  ;;  %v342_v61 = vld [vmem:[%s2557_s30 + $0x660] sm:$0xff] }
  0xf3   : > { %v2181_v7 = vpop.eup %2180  ;;  %1587 = vst [vmem:[%s2590_s17 + $0x548] sm:$0xff] %v1331_v62  ;;  %v1333_v8 = vadd.f32 0.5, %v1077_v63  ;;  %v1079_v9 = vmul.f32 0.5, %v2179_v2  ;;  %2206 = vtanh.f32 %v581_v54  ;;  %v596_v1 = vmul.f32 0.5, %v340_v51  ;;  %v343_v2 = vld [vmem:[%s2557_s30 + $0x668] sm:$0xff] }
  0xf4   : > { %v2183_v12 = vpop.eup %2182  ;;  %1588 = vst [vmem:[%s2590_s17 + $0x550] sm:$0xff] %v1332_v3  ;;  %v1334_v13 = vadd.f32 0.5, %v1078_v4  ;;  %v1080_v14 = vmul.f32 0.5, %v2181_v7  ;;  %2208 = vtanh.f32 %v582_v59  ;;  %v597_v6 = vmul.f32 0.5, %v341_v56  ;;  %v344_v7 = vld [vmem:[%s2557_s30 + $0x670] sm:$0xff] }
  0xf5   : > { %v2185_v17 = vpop.eup %2184  ;;  %1589 = vst [vmem:[%s2590_s17 + $0x558] sm:$0xff] %v1333_v8  ;;  %v1335_v18 = vadd.f32 0.5, %v1079_v9  ;;  %v1081_v19 = vmul.f32 0.5, %v2183_v12  ;;  %2210 = vtanh.f32 %v583_v0  ;;  %v598_v11 = vmul.f32 0.5, %v342_v61  ;;  %v345_v12 = vld [vmem:[%s2557_s30 + $0x678] sm:$0xff] }
  0xf6   : > { %v2187_v22 = vpop.eup %2186  ;;  %1590 = vst [vmem:[%s2590_s17 + $0x560] sm:$0xff] %v1334_v13  ;;  %v1336_v23 = vadd.f32 0.5, %v1080_v14  ;;  %v1082_v24 = vmul.f32 0.5, %v2185_v17  ;;  %2212 = vtanh.f32 %v584_v5  ;;  %v599_v16 = vmul.f32 0.5, %v343_v2  ;;  %v346_v17 = vld [vmem:[%s2557_s30 + $0x680] sm:$0xff] }
  0xf7   : > { %v2189_v27 = vpop.eup %2188  ;;  %1591 = vst [vmem:[%s2590_s17 + $0x568] sm:$0xff] %v1335_v18  ;;  %v1337_v28 = vadd.f32 0.5, %v1081_v19  ;;  %v1083_v29 = vmul.f32 0.5, %v2187_v22  ;;  %2214 = vtanh.f32 %v585_v10  ;;  %v600_v21 = vmul.f32 0.5, %v344_v7  ;;  %v347_v22 = vld [vmem:[%s2557_s30 + $0x688] sm:$0xff] }
  0xf8   : > { %v2191_v32 = vpop.eup %2190  ;;  %1592 = vst [vmem:[%s2590_s17 + $0x570] sm:$0xff] %v1336_v23  ;;  %v1338_v33 = vadd.f32 0.5, %v1082_v24  ;;  %v1084_v34 = vmul.f32 0.5, %v2189_v27  ;;  %2216 = vtanh.f32 %v586_v15  ;;  %v601_v26 = vmul.f32 0.5, %v345_v12  ;;  %v348_v27 = vld [vmem:[%s2557_s30 + $0x690] sm:$0xff] }
  0xf9   : > { %v2193_v37 = vpop.eup %2192  ;;  %1593 = vst [vmem:[%s2590_s17 + $0x578] sm:$0xff] %v1337_v28  ;;  %v1339_v38 = vadd.f32 0.5, %v1083_v29  ;;  %v1085_v39 = vmul.f32 0.5, %v2191_v32  ;;  %2218 = vtanh.f32 %v587_v20  ;;  %v602_v31 = vmul.f32 0.5, %v346_v17  ;;  %v349_v32 = vld [vmem:[%s2557_s30 + $0x698] sm:$0xff] }
  0xfa   : > { %v2195_v42 = vpop.eup %2194  ;;  %1594 = vst [vmem:[%s2590_s17 + $0x580] sm:$0xff] %v1338_v33  ;;  %v1340_v43 = vadd.f32 0.5, %v1084_v34  ;;  %v1086_v44 = vmul.f32 0.5, %v2193_v37  ;;  %2220 = vtanh.f32 %v588_v25  ;;  %v603_v36 = vmul.f32 0.5, %v347_v22  ;;  %v350_v37 = vld [vmem:[%s2557_s30 + $0x6a0] sm:$0xff] }
  0xfb   : > { %v2197_v47 = vpop.eup %2196  ;;  %1595 = vst [vmem:[%s2590_s17 + $0x588] sm:$0xff] %v1339_v38  ;;  %v1341_v48 = vadd.f32 0.5, %v1085_v39  ;;  %v1087_v49 = vmul.f32 0.5, %v2195_v42  ;;  %2222 = vtanh.f32 %v589_v30  ;;  %v604_v41 = vmul.f32 0.5, %v348_v27  ;;  %v351_v42 = vld [vmem:[%s2557_s30 + $0x6a8] sm:$0xff] }
  0xfc   : > { %v2199_v52 = vpop.eup %2198  ;;  %1596 = vst [vmem:[%s2590_s17 + $0x590] sm:$0xff] %v1340_v43  ;;  %v1342_v53 = vadd.f32 0.5, %v1086_v44  ;;  %v1088_v54 = vmul.f32 0.5, %v2197_v47  ;;  %2224 = vtanh.f32 %v590_v35  ;;  %v605_v46 = vmul.f32 0.5, %v349_v32  ;;  %v352_v47 = vld [vmem:[%s2557_s30 + $0x6b0] sm:$0xff] }
  0xfd   : > { %v2201_v57 = vpop.eup %2200  ;;  %1597 = vst [vmem:[%s2590_s17 + $0x598] sm:$0xff] %v1341_v48  ;;  %v1343_v58 = vadd.f32 0.5, %v1087_v49  ;;  %v1089_v59 = vmul.f32 0.5, %v2199_v52  ;;  %2226 = vtanh.f32 %v591_v40  ;;  %v606_v51 = vmul.f32 0.5, %v350_v37  ;;  %v353_v52 = vld [vmem:[%s2557_s30 + $0x6b8] sm:$0xff] }
  0xfe   : > { %v2203_v62 = vpop.eup %2202  ;;  %1598 = vst [vmem:[%s2590_s17 + $0x5a0] sm:$0xff] %v1342_v53  ;;  %v1344_v63 = vadd.f32 0.5, %v1088_v54  ;;  %v1090_v0 = vmul.f32 0.5, %v2201_v57  ;;  %2228 = vtanh.f32 %v592_v45  ;;  %v607_v56 = vmul.f32 0.5, %v351_v42  ;;  %v354_v57 = vld [vmem:[%s2557_s30 + $0x6c0] sm:$0xff] }
  0xff   : > { %v2205_v3 = vpop.eup %2204  ;;  %1599 = vst [vmem:[%s2590_s17 + $0x5a8] sm:$0xff] %v1343_v58  ;;  %v1345_v4 = vadd.f32 0.5, %v1089_v59  ;;  %v1091_v5 = vmul.f32 0.5, %v2203_v62  ;;  %2230 = vtanh.f32 %v593_v50  ;;  %v608_v61 = vmul.f32 0.5, %v352_v47  ;;  %v355_v62 = vld [vmem:[%s2557_s30 + $0x6c8] sm:$0xff] }
 0x100   : > { %v2207_v8 = vpop.eup %2206  ;;  %1600 = vst [vmem:[%s2590_s17 + $0x5b0] sm:$0xff] %v1344_v63  ;;  %v1346_v9 = vadd.f32 0.5, %v1090_v0  ;;  %v1092_v10 = vmul.f32 0.5, %v2205_v3  ;;  %2232 = vtanh.f32 %v594_v55  ;;  %v609_v2 = vmul.f32 0.5, %v353_v52  ;;  %v356_v3 = vld [vmem:[%s2557_s30 + $0x6d0] sm:$0xff] }
 0x101   : > { %v2209_v13 = vpop.eup %2208  ;;  %1601 = vst [vmem:[%s2590_s17 + $0x5b8] sm:$0xff] %v1345_v4  ;;  %v1347_v14 = vadd.f32 0.5, %v1091_v5  ;;  %v1093_v15 = vmul.f32 0.5, %v2207_v8  ;;  %2234 = vtanh.f32 %v595_v60  ;;  %v610_v7 = vmul.f32 0.5, %v354_v57  ;;  %v357_v8 = vld [vmem:[%s2557_s30 + $0x6d8] sm:$0xff] }
 0x102   : > { %v2211_v18 = vpop.eup %2210  ;;  %1602 = vst [vmem:[%s2590_s17 + $0x5c0] sm:$0xff] %v1346_v9  ;;  %v1348_v19 = vadd.f32 0.5, %v1092_v10  ;;  %v1094_v20 = vmul.f32 0.5, %v2209_v13  ;;  %2236 = vtanh.f32 %v596_v1  ;;  %v611_v12 = vmul.f32 0.5, %v355_v62  ;;  %v358_v13 = vld [vmem:[%s2557_s30 + $0x6e0] sm:$0xff] }
 0x103   : > { %v2213_v23 = vpop.eup %2212  ;;  %1603 = vst [vmem:[%s2590_s17 + $0x5c8] sm:$0xff] %v1347_v14  ;;  %v1349_v24 = vadd.f32 0.5, %v1093_v15  ;;  %v1095_v25 = vmul.f32 0.5, %v2211_v18  ;;  %2238 = vtanh.f32 %v597_v6  ;;  %v612_v17 = vmul.f32 0.5, %v356_v3  ;;  %v359_v18 = vld [vmem:[%s2557_s30 + $0x6e8] sm:$0xff] }
 0x104   : > { %v2215_v28 = vpop.eup %2214  ;;  %1604 = vst [vmem:[%s2590_s17 + $0x5d0] sm:$0xff] %v1348_v19  ;;  %v1350_v29 = vadd.f32 0.5, %v1094_v20  ;;  %v1096_v30 = vmul.f32 0.5, %v2213_v23  ;;  %2240 = vtanh.f32 %v598_v11  ;;  %v613_v22 = vmul.f32 0.5, %v357_v8  ;;  %v360_v23 = vld [vmem:[%s2557_s30 + $0x6f0] sm:$0xff] }
 0x105   : > { %v2217_v33 = vpop.eup %2216  ;;  %1605 = vst [vmem:[%s2590_s17 + $0x5d8] sm:$0xff] %v1349_v24  ;;  %v1351_v34 = vadd.f32 0.5, %v1095_v25  ;;  %v1097_v35 = vmul.f32 0.5, %v2215_v28  ;;  %2242 = vtanh.f32 %v599_v16  ;;  %v614_v27 = vmul.f32 0.5, %v358_v13  ;;  %v361_v28 = vld [vmem:[%s2557_s30 + $0x6f8] sm:$0xff] }
 0x106   : > { %v2219_v38 = vpop.eup %2218  ;;  %1606 = vst [vmem:[%s2590_s17 + $0x5e0] sm:$0xff] %v1350_v29  ;;  %v1352_v39 = vadd.f32 0.5, %v1096_v30  ;;  %v1098_v40 = vmul.f32 0.5, %v2217_v33  ;;  %2244 = vtanh.f32 %v600_v21  ;;  %v615_v32 = vmul.f32 0.5, %v359_v18  ;;  %v362_v33 = vld [vmem:[%s2557_s30 + $0x700] sm:$0xff] }
 0x107   : > { %v2221_v43 = vpop.eup %2220  ;;  %1607 = vst [vmem:[%s2590_s17 + $0x5e8] sm:$0xff] %v1351_v34  ;;  %v1353_v44 = vadd.f32 0.5, %v1097_v35  ;;  %v1099_v45 = vmul.f32 0.5, %v2219_v38  ;;  %2246 = vtanh.f32 %v601_v26  ;;  %v616_v37 = vmul.f32 0.5, %v360_v23  ;;  %v363_v38 = vld [vmem:[%s2557_s30 + $0x708] sm:$0xff] }
 0x108   : > { %v2223_v48 = vpop.eup %2222  ;;  %1608 = vst [vmem:[%s2590_s17 + $0x5f0] sm:$0xff] %v1352_v39  ;;  %v1354_v49 = vadd.f32 0.5, %v1098_v40  ;;  %v1100_v50 = vmul.f32 0.5, %v2221_v43  ;;  %2248 = vtanh.f32 %v602_v31  ;;  %v617_v42 = vmul.f32 0.5, %v361_v28  ;;  %v364_v43 = vld [vmem:[%s2557_s30 + $0x710] sm:$0xff] }
 0x109   : > { %v2225_v53 = vpop.eup %2224  ;;  %1609 = vst [vmem:[%s2590_s17 + $0x5f8] sm:$0xff] %v1353_v44  ;;  %v1355_v54 = vadd.f32 0.5, %v1099_v45  ;;  %v1101_v55 = vmul.f32 0.5, %v2223_v48  ;;  %2250 = vtanh.f32 %v603_v36  ;;  %v618_v47 = vmul.f32 0.5, %v362_v33  ;;  %v365_v48 = vld [vmem:[%s2557_s30 + $0x718] sm:$0xff] }
 0x10a   : > { %v2227_v58 = vpop.eup %2226  ;;  %1610 = vst [vmem:[%s2590_s17 + $0x600] sm:$0xff] %v1354_v49  ;;  %v1356_v59 = vadd.f32 0.5, %v1100_v50  ;;  %v1102_v60 = vmul.f32 0.5, %v2225_v53  ;;  %2252 = vtanh.f32 %v604_v41  ;;  %v619_v52 = vmul.f32 0.5, %v363_v38  ;;  %v366_v53 = vld [vmem:[%s2557_s30 + $0x720] sm:$0xff] }
 0x10b   : > { %v2229_v63 = vpop.eup %2228  ;;  %1611 = vst [vmem:[%s2590_s17 + $0x608] sm:$0xff] %v1355_v54  ;;  %v1357_v0 = vadd.f32 0.5, %v1101_v55  ;;  %v1103_v1 = vmul.f32 0.5, %v2227_v58  ;;  %2254 = vtanh.f32 %v605_v46  ;;  %v620_v57 = vmul.f32 0.5, %v364_v43  ;;  %v367_v58 = vld [vmem:[%s2557_s30 + $0x728] sm:$0xff] }
 0x10c   : > { %v2231_v4 = vpop.eup %2230  ;;  %1612 = vst [vmem:[%s2590_s17 + $0x610] sm:$0xff] %v1356_v59  ;;  %v1358_v5 = vadd.f32 0.5, %v1102_v60  ;;  %v1104_v6 = vmul.f32 0.5, %v2229_v63  ;;  %2256 = vtanh.f32 %v606_v51  ;;  %v621_v62 = vmul.f32 0.5, %v365_v48  ;;  %v368_v63 = vld [vmem:[%s2557_s30 + $0x730] sm:$0xff] }
 0x10d   : > { %v2233_v9 = vpop.eup %2232  ;;  %1613 = vst [vmem:[%s2590_s17 + $0x618] sm:$0xff] %v1357_v0  ;;  %v1359_v10 = vadd.f32 0.5, %v1103_v1  ;;  %v1105_v11 = vmul.f32 0.5, %v2231_v4  ;;  %2258 = vtanh.f32 %v607_v56  ;;  %v622_v3 = vmul.f32 0.5, %v366_v53  ;;  %v369_v4 = vld [vmem:[%s2557_s30 + $0x738] sm:$0xff] }
 0x10e   : > { %v2235_v14 = vpop.eup %2234  ;;  %1614 = vst [vmem:[%s2590_s17 + $0x620] sm:$0xff] %v1358_v5  ;;  %v1360_v15 = vadd.f32 0.5, %v1104_v6  ;;  %v1106_v16 = vmul.f32 0.5, %v2233_v9  ;;  %2260 = vtanh.f32 %v608_v61  ;;  %v623_v8 = vmul.f32 0.5, %v367_v58  ;;  %v370_v9 = vld [vmem:[%s2557_s30 + $0x740] sm:$0xff] }
 0x10f   : > { %v2237_v19 = vpop.eup %2236  ;;  %1615 = vst [vmem:[%s2590_s17 + $0x628] sm:$0xff] %v1359_v10  ;;  %v1361_v20 = vadd.f32 0.5, %v1105_v11  ;;  %v1107_v21 = vmul.f32 0.5, %v2235_v14  ;;  %2262 = vtanh.f32 %v609_v2  ;;  %v624_v13 = vmul.f32 0.5, %v368_v63  ;;  %v371_v14 = vld [vmem:[%s2557_s30 + $0x748] sm:$0xff] }
 0x110   : > { %v2239_v24 = vpop.eup %2238  ;;  %1616 = vst [vmem:[%s2590_s17 + $0x630] sm:$0xff] %v1360_v15  ;;  %v1362_v25 = vadd.f32 0.5, %v1106_v16  ;;  %v1108_v26 = vmul.f32 0.5, %v2237_v19  ;;  %2264 = vtanh.f32 %v610_v7  ;;  %v625_v18 = vmul.f32 0.5, %v369_v4  ;;  %v372_v19 = vld [vmem:[%s2557_s30 + $0x750] sm:$0xff] }
 0x111   : > { %v2241_v29 = vpop.eup %2240  ;;  %1617 = vst [vmem:[%s2590_s17 + $0x638] sm:$0xff] %v1361_v20  ;;  %v1363_v30 = vadd.f32 0.5, %v1107_v21  ;;  %v1109_v31 = vmul.f32 0.5, %v2239_v24  ;;  %2266 = vtanh.f32 %v611_v12  ;;  %v626_v23 = vmul.f32 0.5, %v370_v9  ;;  %v373_v24 = vld [vmem:[%s2557_s30 + $0x758] sm:$0xff] }
 0x112   : > { %v2243_v34 = vpop.eup %2242  ;;  %1618 = vst [vmem:[%s2590_s17 + $0x640] sm:$0xff] %v1362_v25  ;;  %v1364_v35 = vadd.f32 0.5, %v1108_v26  ;;  %v1110_v36 = vmul.f32 0.5, %v2241_v29  ;;  %2268 = vtanh.f32 %v612_v17  ;;  %v627_v28 = vmul.f32 0.5, %v371_v14  ;;  %v374_v29 = vld [vmem:[%s2557_s30 + $0x760] sm:$0xff] }
 0x113   : > { %v2245_v39 = vpop.eup %2244  ;;  %1619 = vst [vmem:[%s2590_s17 + $0x648] sm:$0xff] %v1363_v30  ;;  %v1365_v40 = vadd.f32 0.5, %v1109_v31  ;;  %v1111_v41 = vmul.f32 0.5, %v2243_v34  ;;  %2270 = vtanh.f32 %v613_v22  ;;  %v628_v33 = vmul.f32 0.5, %v372_v19  ;;  %v375_v34 = vld [vmem:[%s2557_s30 + $0x768] sm:$0xff] }
 0x114   : > { %v2247_v44 = vpop.eup %2246  ;;  %1620 = vst [vmem:[%s2590_s17 + $0x650] sm:$0xff] %v1364_v35  ;;  %v1366_v45 = vadd.f32 0.5, %v1110_v36  ;;  %v1112_v46 = vmul.f32 0.5, %v2245_v39  ;;  %2272 = vtanh.f32 %v614_v27  ;;  %v629_v38 = vmul.f32 0.5, %v373_v24  ;;  %v376_v39 = vld [vmem:[%s2557_s30 + $0x770] sm:$0xff] }
 0x115   : > { %v2249_v49 = vpop.eup %2248  ;;  %1621 = vst [vmem:[%s2590_s17 + $0x658] sm:$0xff] %v1365_v40  ;;  %v1367_v50 = vadd.f32 0.5, %v1111_v41  ;;  %v1113_v51 = vmul.f32 0.5, %v2247_v44  ;;  %2274 = vtanh.f32 %v615_v32  ;;  %v630_v43 = vmul.f32 0.5, %v374_v29  ;;  %v377_v44 = vld [vmem:[%s2557_s30 + $0x778] sm:$0xff] }
 0x116   : > { %v2251_v54 = vpop.eup %2250  ;;  %1622 = vst [vmem:[%s2590_s17 + $0x660] sm:$0xff] %v1366_v45  ;;  %v1368_v55 = vadd.f32 0.5, %v1112_v46  ;;  %v1114_v56 = vmul.f32 0.5, %v2249_v49  ;;  %2276 = vtanh.f32 %v616_v37  ;;  %v631_v48 = vmul.f32 0.5, %v375_v34  ;;  %v378_v49 = vld [vmem:[%s2557_s30 + $0x780] sm:$0xff] }
 0x117   : > { %v2253_v59 = vpop.eup %2252  ;;  %1623 = vst [vmem:[%s2590_s17 + $0x668] sm:$0xff] %v1367_v50  ;;  %v1369_v60 = vadd.f32 0.5, %v1113_v51  ;;  %v1115_v61 = vmul.f32 0.5, %v2251_v54  ;;  %2278 = vtanh.f32 %v617_v42  ;;  %v632_v53 = vmul.f32 0.5, %v376_v39  ;;  %v379_v54 = vld [vmem:[%s2557_s30 + $0x788] sm:$0xff] }
 0x118   : > { %v2255_v0 = vpop.eup %2254  ;;  %1624 = vst [vmem:[%s2590_s17 + $0x670] sm:$0xff] %v1368_v55  ;;  %v1370_v1 = vadd.f32 0.5, %v1114_v56  ;;  %v1116_v2 = vmul.f32 0.5, %v2253_v59  ;;  %2280 = vtanh.f32 %v618_v47  ;;  %v633_v58 = vmul.f32 0.5, %v377_v44  ;;  %v380_v59 = vld [vmem:[%s2557_s30 + $0x790] sm:$0xff] }
 0x119   : > { %v2257_v5 = vpop.eup %2256  ;;  %1625 = vst [vmem:[%s2590_s17 + $0x678] sm:$0xff] %v1369_v60  ;;  %v1371_v6 = vadd.f32 0.5, %v1115_v61  ;;  %v1117_v7 = vmul.f32 0.5, %v2255_v0  ;;  %2282 = vtanh.f32 %v619_v52  ;;  %v634_v63 = vmul.f32 0.5, %v378_v49  ;;  %v381_v0 = vld [vmem:[%s2557_s30 + $0x798] sm:$0xff] }
 0x11a   : > { %v2259_v10 = vpop.eup %2258  ;;  %1626 = vst [vmem:[%s2590_s17 + $0x680] sm:$0xff] %v1370_v1  ;;  %v1372_v11 = vadd.f32 0.5, %v1116_v2  ;;  %v1118_v12 = vmul.f32 0.5, %v2257_v5  ;;  %2284 = vtanh.f32 %v620_v57  ;;  %v635_v4 = vmul.f32 0.5, %v379_v54  ;;  %v382_v5 = vld [vmem:[%s2557_s30 + $0x7a0] sm:$0xff] }
 0x11b   : > { %v2261_v15 = vpop.eup %2260  ;;  %1627 = vst [vmem:[%s2590_s17 + $0x688] sm:$0xff] %v1371_v6  ;;  %v1373_v16 = vadd.f32 0.5, %v1117_v7  ;;  %v1119_v17 = vmul.f32 0.5, %v2259_v10  ;;  %2286 = vtanh.f32 %v621_v62  ;;  %v636_v9 = vmul.f32 0.5, %v380_v59  ;;  %v383_v10 = vld [vmem:[%s2557_s30 + $0x7a8] sm:$0xff] }
 0x11c   : > { %v2263_v20 = vpop.eup %2262  ;;  %1628 = vst [vmem:[%s2590_s17 + $0x690] sm:$0xff] %v1372_v11  ;;  %v1374_v21 = vadd.f32 0.5, %v1118_v12  ;;  %v1120_v22 = vmul.f32 0.5, %v2261_v15  ;;  %2288 = vtanh.f32 %v622_v3  ;;  %v637_v14 = vmul.f32 0.5, %v381_v0  ;;  %v384_v15 = vld [vmem:[%s2557_s30 + $0x7b0] sm:$0xff] }
 0x11d   : > { %v2265_v25 = vpop.eup %2264  ;;  %1629 = vst [vmem:[%s2590_s17 + $0x698] sm:$0xff] %v1373_v16  ;;  %v1375_v26 = vadd.f32 0.5, %v1119_v17  ;;  %v1121_v27 = vmul.f32 0.5, %v2263_v20  ;;  %2290 = vtanh.f32 %v623_v8  ;;  %v638_v19 = vmul.f32 0.5, %v382_v5  ;;  %v385_v20 = vld [vmem:[%s2557_s30 + $0x7b8] sm:$0xff] }
 0x11e   : > { %v2267_v30 = vpop.eup %2266  ;;  %1630 = vst [vmem:[%s2590_s17 + $0x6a0] sm:$0xff] %v1374_v21  ;;  %v1376_v31 = vadd.f32 0.5, %v1120_v22  ;;  %v1122_v32 = vmul.f32 0.5, %v2265_v25  ;;  %2292 = vtanh.f32 %v624_v13  ;;  %v639_v24 = vmul.f32 0.5, %v383_v10  ;;  %v386_v25 = vld [vmem:[%s2557_s30 + $0x7c0] sm:$0xff] }
 0x11f   : > { %v2269_v35 = vpop.eup %2268  ;;  %1631 = vst [vmem:[%s2590_s17 + $0x6a8] sm:$0xff] %v1375_v26  ;;  %v1377_v36 = vadd.f32 0.5, %v1121_v27  ;;  %v1123_v37 = vmul.f32 0.5, %v2267_v30  ;;  %2294 = vtanh.f32 %v625_v18  ;;  %v640_v29 = vmul.f32 0.5, %v384_v15  ;;  %v387_v30 = vld [vmem:[%s2557_s30 + $0x7c8] sm:$0xff] }
 0x120   : > { %v2271_v40 = vpop.eup %2270  ;;  %1632 = vst [vmem:[%s2590_s17 + $0x6b0] sm:$0xff] %v1376_v31  ;;  %v1378_v41 = vadd.f32 0.5, %v1122_v32  ;;  %v1124_v42 = vmul.f32 0.5, %v2269_v35  ;;  %2296 = vtanh.f32 %v626_v23  ;;  %v641_v34 = vmul.f32 0.5, %v385_v20  ;;  %v388_v35 = vld [vmem:[%s2557_s30 + $0x7d0] sm:$0xff] }
 0x121   : > { %v2273_v45 = vpop.eup %2272  ;;  %1633 = vst [vmem:[%s2590_s17 + $0x6b8] sm:$0xff] %v1377_v36  ;;  %v1379_v46 = vadd.f32 0.5, %v1123_v37  ;;  %v1125_v47 = vmul.f32 0.5, %v2271_v40  ;;  %2298 = vtanh.f32 %v627_v28  ;;  %v642_v39 = vmul.f32 0.5, %v386_v25  ;;  %v389_v40 = vld [vmem:[%s2557_s30 + $0x7d8] sm:$0xff] }
 0x122   : > { %v2275_v50 = vpop.eup %2274  ;;  %1634 = vst [vmem:[%s2590_s17 + $0x6c0] sm:$0xff] %v1378_v41  ;;  %v1380_v51 = vadd.f32 0.5, %v1124_v42  ;;  %v1126_v52 = vmul.f32 0.5, %v2273_v45  ;;  %2300 = vtanh.f32 %v628_v33  ;;  %v643_v44 = vmul.f32 0.5, %v387_v30  ;;  %v390_v45 = vld [vmem:[%s2557_s30 + $0x7e0] sm:$0xff] }
 0x123   : > { %v2277_v55 = vpop.eup %2276  ;;  %1635 = vst [vmem:[%s2590_s17 + $0x6c8] sm:$0xff] %v1379_v46  ;;  %v1381_v56 = vadd.f32 0.5, %v1125_v47  ;;  %v1127_v57 = vmul.f32 0.5, %v2275_v50  ;;  %2302 = vtanh.f32 %v629_v38  ;;  %v644_v49 = vmul.f32 0.5, %v388_v35  ;;  %v391_v50 = vld [vmem:[%s2557_s30 + $0x7e8] sm:$0xff] }
 0x124   : > { %v2279_v60 = vpop.eup %2278  ;;  %1636 = vst [vmem:[%s2590_s17 + $0x6d0] sm:$0xff] %v1380_v51  ;;  %v1382_v61 = vadd.f32 0.5, %v1126_v52  ;;  %v1128_v62 = vmul.f32 0.5, %v2277_v55  ;;  %2304 = vtanh.f32 %v630_v43  ;;  %v645_v54 = vmul.f32 0.5, %v389_v40  ;;  %v392_v55 = vld [vmem:[%s2557_s30 + $0x7f0] sm:$0xff] }
 0x125   : > { %v2281_v1 = vpop.eup %2280  ;;  %1637 = vst [vmem:[%s2590_s17 + $0x6d8] sm:$0xff] %v1381_v56  ;;  %v1383_v2 = vadd.f32 0.5, %v1127_v57  ;;  %v1129_v3 = vmul.f32 0.5, %v2279_v60  ;;  %2306 = vtanh.f32 %v631_v48  ;;  %v646_v59 = vmul.f32 0.5, %v390_v45  ;;  %v393_v60 = vld [vmem:[%s2557_s30 + $0x7f8] sm:$0xff] }
 0x126   : > { %v2283_v6 = vpop.eup %2282  ;;  %1638 = vst [vmem:[%s2590_s17 + $0x6e0] sm:$0xff] %v1382_v61  ;;  %v1384_v7 = vadd.f32 0.5, %v1128_v62  ;;  %v1130_v8 = vmul.f32 0.5, %v2281_v1  ;;  %2308 = vtanh.f32 %v632_v53  ;;  %v647_v0 = vmul.f32 0.5, %v391_v50 }
 0x127   : > { %v2285_v11 = vpop.eup %2284  ;;  %1639 = vst [vmem:[%s2590_s17 + $0x6e8] sm:$0xff] %v1383_v2  ;;  %v1385_v12 = vadd.f32 0.5, %v1129_v3  ;;  %v1131_v13 = vmul.f32 0.5, %v2283_v6  ;;  %2310 = vtanh.f32 %v633_v58 }
 0x128   : > { %v2287_v16 = vpop.eup %2286  ;;  %1640 = vst [vmem:[%s2590_s17 + $0x6f0] sm:$0xff] %v1384_v7  ;;  %v1386_v17 = vadd.f32 0.5, %v1130_v8  ;;  %v1132_v18 = vmul.f32 0.5, %v2285_v11  ;;  %2312 = vtanh.f32 %v634_v63  ;;  %v649_v8 = vmul.f32 0.5, %v393_v60 }
 0x129   : > { %v2289_v21 = vpop.eup %2288  ;;  %1641 = vst [vmem:[%s2590_s17 + $0x6f8] sm:$0xff] %v1385_v12  ;;  %v1387_v22 = vadd.f32 0.5, %v1131_v13  ;;  %v1133_v23 = vmul.f32 0.5, %v2287_v16  ;;  %2314 = vtanh.f32 %v635_v4  ;;  %v648_v4 = vmul.f32 0.5, %v392_v55 }
 0x12a   : > { %v2291_v26 = vpop.eup %2290  ;;  %1642 = vst [vmem:[%s2590_s17 + $0x700] sm:$0xff] %v1386_v17  ;;  %v1388_v27 = vadd.f32 0.5, %v1132_v18  ;;  %v1134_v28 = vmul.f32 0.5, %v2289_v21  ;;  %2316 = vtanh.f32 %v636_v9 }
 0x12b   : > { %v2293_v31 = vpop.eup %2292  ;;  %1643 = vst [vmem:[%s2590_s17 + $0x708] sm:$0xff] %v1387_v22  ;;  %v1389_v32 = vadd.f32 0.5, %v1133_v23  ;;  %v1135_v33 = vmul.f32 0.5, %v2291_v26  ;;  %2318 = vtanh.f32 %v637_v14 }
 0x12c   : > { %v2295_v36 = vpop.eup %2294  ;;  %1644 = vst [vmem:[%s2590_s17 + $0x710] sm:$0xff] %v1388_v27  ;;  %v1390_v37 = vadd.f32 0.5, %v1134_v28  ;;  %v1136_v38 = vmul.f32 0.5, %v2293_v31  ;;  %2320 = vtanh.f32 %v638_v19 }
 0x12d   : > { %v2297_v41 = vpop.eup %2296  ;;  %1645 = vst [vmem:[%s2590_s17 + $0x718] sm:$0xff] %v1389_v32  ;;  %v1391_v42 = vadd.f32 0.5, %v1135_v33  ;;  %v1137_v43 = vmul.f32 0.5, %v2295_v36  ;;  %2322 = vtanh.f32 %v639_v24 }
 0x12e   : > { %v2299_v46 = vpop.eup %2298  ;;  %1646 = vst [vmem:[%s2590_s17 + $0x720] sm:$0xff] %v1390_v37  ;;  %v1392_v47 = vadd.f32 0.5, %v1136_v38  ;;  %v1138_v48 = vmul.f32 0.5, %v2297_v41  ;;  %2324 = vtanh.f32 %v640_v29 }
 0x12f   : > { %v2301_v51 = vpop.eup %2300  ;;  %1647 = vst [vmem:[%s2590_s17 + $0x728] sm:$0xff] %v1391_v42  ;;  %v1393_v52 = vadd.f32 0.5, %v1137_v43  ;;  %v1139_v53 = vmul.f32 0.5, %v2299_v46  ;;  %2326 = vtanh.f32 %v641_v34 }
 0x130   : > { %v2303_v56 = vpop.eup %2302  ;;  %1648 = vst [vmem:[%s2590_s17 + $0x730] sm:$0xff] %v1392_v47  ;;  %v1394_v57 = vadd.f32 0.5, %v1138_v48  ;;  %v1140_v58 = vmul.f32 0.5, %v2301_v51  ;;  %2328 = vtanh.f32 %v642_v39 }
 0x131   : > { %v2305_v61 = vpop.eup %2304  ;;  %1649 = vst [vmem:[%s2590_s17 + $0x738] sm:$0xff] %v1393_v52  ;;  %v1395_v62 = vadd.f32 0.5, %v1139_v53  ;;  %v1141_v63 = vmul.f32 0.5, %v2303_v56  ;;  %2330 = vtanh.f32 %v643_v44 }
 0x132   : > { %v2307_v1 = vpop.eup %2306  ;;  %1650 = vst [vmem:[%s2590_s17 + $0x740] sm:$0xff] %v1394_v57  ;;  %v1396_v2 = vadd.f32 0.5, %v1140_v58  ;;  %v1142_v3 = vmul.f32 0.5, %v2305_v61  ;;  %2332 = vtanh.f32 %v644_v49 }
 0x133   : > { %v2309_v5 = vpop.eup %2308  ;;  %1651 = vst [vmem:[%s2590_s17 + $0x748] sm:$0xff] %v1395_v62  ;;  %v1397_v6 = vadd.f32 0.5, %v1141_v63  ;;  %v1143_v7 = vmul.f32 0.5, %v2307_v1  ;;  %2334 = vtanh.f32 %v645_v54 }
 0x134   : > { %v2311_v9 = vpop.eup %2310  ;;  %1652 = vst [vmem:[%s2590_s17 + $0x750] sm:$0xff] %v1396_v2  ;;  %v1398_v10 = vadd.f32 0.5, %v1142_v3  ;;  %v1144_v11 = vmul.f32 0.5, %v2309_v5  ;;  %2336 = vtanh.f32 %v646_v59 }
 0x135   : > { %v2313_v12 = vpop.eup %2312  ;;  %1653 = vst [vmem:[%s2590_s17 + $0x758] sm:$0xff] %v1397_v6  ;;  %v1399_v13 = vadd.f32 0.5, %v1143_v7  ;;  %v1145_v14 = vmul.f32 0.5, %v2311_v9  ;;  %2338 = vtanh.f32 %v647_v0 }
 0x136   : > { %v2315_v15 = vpop.eup %2314  ;;  %1654 = vst [vmem:[%s2590_s17 + $0x760] sm:$0xff] %v1398_v10  ;;  %v1400_v16 = vadd.f32 0.5, %v1144_v11  ;;  %v1146_v17 = vmul.f32 0.5, %v2313_v12  ;;  %2340 = vtanh.f32 %v648_v4 }
 0x137   : > { %v2317_v18 = vpop.eup %2316  ;;  %1655 = vst [vmem:[%s2590_s17 + $0x768] sm:$0xff] %v1399_v13  ;;  %v1401_v19 = vadd.f32 0.5, %v1145_v14  ;;  %v1147_v20 = vmul.f32 0.5, %v2315_v15  ;;  %2342 = vtanh.f32 %v649_v8 }
 0x138   : > { %v2319_v21 = vpop.eup %2318  ;;  %1656 = vst [vmem:[%s2590_s17 + $0x770] sm:$0xff] %v1400_v16  ;;  %v1402_v22 = vadd.f32 0.5, %v1146_v17  ;;  %v1148_v23 = vmul.f32 0.5, %v2317_v18 }
 0x139   : > { %v2321_v24 = vpop.eup %2320  ;;  %1657 = vst [vmem:[%s2590_s17 + $0x778] sm:$0xff] %v1401_v19  ;;  %v1403_v25 = vadd.f32 0.5, %v1147_v20  ;;  %v1149_v26 = vmul.f32 0.5, %v2319_v21 }
 0x13a   : > { %v2323_v27 = vpop.eup %2322  ;;  %1658 = vst [vmem:[%s2590_s17 + $0x780] sm:$0xff] %v1402_v22  ;;  %v1404_v28 = vadd.f32 0.5, %v1148_v23  ;;  %v1150_v29 = vmul.f32 0.5, %v2321_v24 }
 0x13b   : > { %v2325_v30 = vpop.eup %2324  ;;  %1659 = vst [vmem:[%s2590_s17 + $0x788] sm:$0xff] %v1403_v25  ;;  %v1405_v31 = vadd.f32 0.5, %v1149_v26  ;;  %v1151_v32 = vmul.f32 0.5, %v2323_v27 }
 0x13c   : > { %v2327_v33 = vpop.eup %2326  ;;  %1660 = vst [vmem:[%s2590_s17 + $0x790] sm:$0xff] %v1404_v28  ;;  %v1406_v34 = vadd.f32 0.5, %v1150_v29  ;;  %v1152_v35 = vmul.f32 0.5, %v2325_v30 }
 0x13d   : > { %v2329_v36 = vpop.eup %2328  ;;  %1661 = vst [vmem:[%s2590_s17 + $0x798] sm:$0xff] %v1405_v31  ;;  %v1407_v37 = vadd.f32 0.5, %v1151_v32  ;;  %v1153_v38 = vmul.f32 0.5, %v2327_v33 }
 0x13e   : > { %v2331_v39 = vpop.eup %2330  ;;  %1662 = vst [vmem:[%s2590_s17 + $0x7a0] sm:$0xff] %v1406_v34  ;;  %v1408_v40 = vadd.f32 0.5, %v1152_v35  ;;  %v1154_v41 = vmul.f32 0.5, %v2329_v36 }
 0x13f   : > { %v2333_v42 = vpop.eup %2332  ;;  %1663 = vst [vmem:[%s2590_s17 + $0x7a8] sm:$0xff] %v1407_v37  ;;  %v1409_v43 = vadd.f32 0.5, %v1153_v38  ;;  %v1155_v44 = vmul.f32 0.5, %v2331_v39 }
 0x140   : > { %v2335_v45 = vpop.eup %2334  ;;  %1664 = vst [vmem:[%s2590_s17 + $0x7b0] sm:$0xff] %v1408_v40  ;;  %v1410_v46 = vadd.f32 0.5, %v1154_v41  ;;  %v1156_v47 = vmul.f32 0.5, %v2333_v42 }
 0x141   : > { %v2337_v48 = vpop.eup %2336  ;;  %1665 = vst [vmem:[%s2590_s17 + $0x7b8] sm:$0xff] %v1409_v43  ;;  %v1411_v49 = vadd.f32 0.5, %v1155_v44  ;;  %v1157_v50 = vmul.f32 0.5, %v2335_v45 }
 0x142   : > { %v2339_v51 = vpop.eup %2338  ;;  %1666 = vst [vmem:[%s2590_s17 + $0x7c0] sm:$0xff] %v1410_v46  ;;  %v1412_v52 = vadd.f32 0.5, %v1156_v47  ;;  %v1158_v53 = vmul.f32 0.5, %v2337_v48 }
 0x143   : > { %v2341_v54 = vpop.eup %2340  ;;  %1667 = vst [vmem:[%s2590_s17 + $0x7c8] sm:$0xff] %v1411_v49  ;;  %v1413_v55 = vadd.f32 0.5, %v1157_v50  ;;  %v1159_v56 = vmul.f32 0.5, %v2339_v51 }
 0x144   : > { %v2343_v57 = vpop.eup %2342  ;;  %1668 = vst [vmem:[%s2590_s17 + $0x7d0] sm:$0xff] %v1412_v52  ;;  %v1414_v58 = vadd.f32 0.5, %v1158_v53  ;;  %v1160_v59 = vmul.f32 0.5, %v2341_v54 }
 0x145   : > { %1669 = vst [vmem:[%s2590_s17 + $0x7d8] sm:$0xff] %v1413_v55  ;;  %v1415_v60 = vadd.f32 0.5, %v1159_v56  ;;  %v1161_v61 = vmul.f32 0.5, %v2343_v57 }
 0x146   : > { %1670 = vst [vmem:[%s2590_s17 + $0x7e0] sm:$0xff] %v1414_v58  ;;  %v1416_v62 = vadd.f32 0.5, %v1160_v59 }
 0x147   : > { %1671 = vst [vmem:[%s2590_s17 + $0x7e8] sm:$0xff] %v1415_v60  ;;  %v1417_v63 = vadd.f32 0.5, %v1161_v61 }
 0x148   : > { %1672 = vst [vmem:[%s2590_s17 + $0x7f0] sm:$0xff] %v1416_v62 }
 0x149   : > { %1673 = vst [vmem:[%s2590_s17 + $0x7f8] sm:$0xff] %v1417_v63 }
 0x14a   : > { %2385 = shalt.err (!%p2382_p10)
}
 0x14b   : > { %s2386_s13 = scalar_lea.hbm %s3081_s2, 32768  ;;  %s2390_s20 = scalar_lea.hbm %s3130_s1, 65536 }
 0x14c   : > { %p2387_p0 = scmp.ne.s32.totalorder %s3081_s2, %s2386_s13  ;;  %p2391_p1 = scmp.lt.s32.totalorder %s3081_s2, %s3130_s1 }
 0x14d   : > { %p2392_p3 = scmp.lt.s32.totalorder %s2390_s20, %s2386_s13 }
 0x14e   : > { %p2388_p2 = pnand %p2387_p0, %p3139_p12 }
 0x14f   : > { %p2393_p6 = por %p2392_p3, %p2391_p1 }
 0x150   : > { %p2389_p9 = pneg %p2388_p2 }
 0x152   : > { %p2394_p11 = pnand %p2393_p6, %p2389_p9 }
 0x154   : > { %2397 = shalt.err (!%p2394_p11)
}
 0x155   : > { %s2442_s24 = smov 1024   ;;  %s2443_s26 = smov 64  }
 0x156   : > { %1784 = dma.vmem_to_hbm [thread:$0]  (%p3139_p12), %s3083_s27, 32768, %s3081_s2, %s1675_s10, %s2442_s24, %s2442_s24, %s2443_s26  }
 0x157 PF: > { %s1704_s30 = sand.u32 1, %s2424_s6   ;;  %p3140_p13 = scmp.ne.s32.totalorder %s3136_s19, 0 }
 0x158   : > { %p3141_p4 = scmp.ge.s32.totalorder %s2436_s9, 2  ;;  %s1705_s17 = scalar_lea.sflag [#allocation4], %s1704_s30 }
 0x15a   : > { %p1791_p5 = pnand %p3141_p4, %p3140_p13 }
 0x15c   : > { %p1792_p7 = pneg %p1791_p5 }
 0x15e   : > { %2419 = dma.done.wait (%p1792_p7), %s1705_s17, 32768  }
 0x15f   : > { %2421 = vsyncadd (%p1792_p7), %s1705_s17, 4294934528  ;;  %p14_p8 = scmp.ge.s32.totalorder %s2479_s12, 4   ;;  %s3142_s6 = smov %s2428_s7 }
 0x160   : > { %s3143_s7 = smov %s2432_s8  ;;  %s3144_s8 = smov %s2491_s15 }
 0x161   : > { %s3145_s9 = smov %s2479_s12  ;;  %16 = sbr.rel (!%p14_p8) target bundleno = 5 (0x5), region = 69 }
 0x166   :  { %1710 = vsyncpa [#allocation3], 1 }
 0x167   :  { %1712 = vsyncpa [#allocation3 + $0x1], 1 }
 0x168   :  { %1713 = vsyncpa [#allocation4], 1 }
 0x169   :  { %1715 = vsyncpa [#allocation4 + $0x1], 1 }

</bundles_post_ra>
